<compile_context>
chip_gen: v7x
topology: tpu7x:2x2x1
jax: 0.10.0
libtpu: 0.0.40
codegen_flags: <defaults>
</compile_context>

<pallas_src>
import functools

import jax
import jax.numpy as jnp
from jax.experimental import pallas as pl
from jax.experimental.pallas import tpu as pltpu


def _mlp_kernel(x_ref, wgu_ref, wd_ref, o_ref, acc_ref, *, ti):
    """One (m-tile, i-tile) step of the SwiGLU MLP.

    Grid axis 0: token tiles (parallel -> megacore shardable).
    Grid axis 1: intermediate-dim tiles (reduction / arbitrary), accumulated
                 into a resident f32 VMEM scratch.
    """
    k = pl.program_id(1)

    @pl.when(k == 0)
    def _():
        acc_ref[...] = jnp.zeros_like(acc_ref)

    x = x_ref[...]                                                    # (tm, H) bf16
    # Fused gate|up projection: one MXU pass over x per step.
    gu = jnp.dot(x, wgu_ref[...], preferred_element_type=jnp.float32)  # (tm, 2*ti)
    g = gu[:, :ti]
    u = gu[:, ti:]
    h = (g * jax.nn.sigmoid(g)) * u                                   # f32 SiLU(gate)*up
    acc_ref[...] += jnp.dot(h.astype(wd_ref.dtype), wd_ref[...],
                            preferred_element_type=jnp.float32)        # (tm, H)

    @pl.when(k == pl.num_programs(1) - 1)
    def _():
        o_ref[...] = acc_ref[...].astype(o_ref.dtype)


def brahma_mlp(x, w_gate, w_up, w_down, *, tm=None, ti=256):
    """x: (B, S, H); w_gate/w_up: (H, I); w_down: (I, H).  Returns (B, S, H)."""
    B, S, H = x.shape
    I = w_gate.shape[1]
    assert w_up.shape == (H, I) and w_down.shape == (I, H)
    M = B * S
    out_dtype = x.dtype

    # ---- tile selection -------------------------------------------------
    if tm is None:
        # Large tm for prefill-sized M (HBM roofline), shrink for small M so
        # the grid still has >= 1 tile and (on v7x) can shard across cores.
        tm = 512 if M >= 512 else 128 * pl.cdiv(M, 128)
    M_pad = tm * pl.cdiv(M, tm)
    I_pad = ti * pl.cdiv(I, ti)
    nk = I_pad // ti

    # ---- bf16 operands + padding (zeros are exact for SwiGLU) -----------
    x2d = x.reshape(M, H).astype(jnp.bfloat16)
    if M_pad != M:
        x2d = jnp.pad(x2d, ((0, M_pad - M), (0, 0)))

    wg = w_gate.astype(jnp.bfloat16)
    wu = w_up.astype(jnp.bfloat16)
    wd = w_down.astype(jnp.bfloat16)
    if I_pad != I:
        wg = jnp.pad(wg, ((0, 0), (0, I_pad - I)))
        wu = jnp.pad(wu, ((0, 0), (0, I_pad - I)))
        wd = jnp.pad(wd, ((0, I_pad - I), (0, 0)))

    # Per-k-tile interleaved [gate_tile | up_tile] slab: block k of width 2*ti
    # holds gate columns and up columns for intermediate tile k, contiguously.
    w_gu = jnp.concatenate(
        [wg.reshape(H, nk, ti), wu.reshape(H, nk, ti)], axis=2
    ).reshape(H, nk * 2 * ti)

    # ---- explicit VMEM budget -------------------------------------------
    bf16 = 2
    budget = (
        2 * (tm * H) * bf16          # x tile, double buffered
        + 2 * (H * 2 * ti) * bf16    # fused gate|up slab, double buffered
        + 2 * (ti * H) * bf16        # down slab, double buffered
        + 2 * (tm * H) * bf16        # output tile, double buffered
        + tm * H * 4                 # f32 accumulator (single buffer)
    )
    vmem_limit = int(min(100 << 20, max(budget * 5 // 4 + (2 << 20), 16 << 20)))

    grid = (M_pad // tm, nk)

    out = pl.pallas_call(
        functools.partial(_mlp_kernel, ti=ti),
        out_shape=jax.ShapeDtypeStruct((M_pad, H), out_dtype),
        grid_spec=pltpu.PrefetchScalarGridSpec(
            num_scalar_prefetch=0,
            grid=grid,
            in_specs=[
                pl.BlockSpec((tm, H), lambda m, k: (m, 0)),        # x tile
                pl.BlockSpec((H, 2 * ti), lambda m, k: (0, k)),    # [gate|up] slab
                pl.BlockSpec((ti, H), lambda m, k: (k, 0)),        # down slab
            ],
            out_specs=pl.BlockSpec((tm, H), lambda m, k: (m, 0)),
            scratch_shapes=[pltpu.VMEM((tm, H), jnp.float32)],
        ),
        compiler_params=pltpu.CompilerParams(
            dimension_semantics=("parallel", "arbitrary"),
            vmem_limit_bytes=vmem_limit,
        ),
    )(x2d, w_gu, wd)

    return out[:M].reshape(B, S, H)


def _reference_bf16(x, w_gate, w_up, w_down):
    """Reference with the same bf16-input / f32-accumulate numerics."""
    xb = x.astype(jnp.bfloat16)
    g = jnp.dot(xb, w_gate.astype(jnp.bfloat16), preferred_element_type=jnp.float32)
    u = jnp.dot(xb, w_up.astype(jnp.bfloat16), preferred_element_type=jnp.float32)
    h = (jax.nn.silu(g) * u).astype(jnp.bfloat16)
    y = jnp.dot(h, w_down.astype(jnp.bfloat16), preferred_element_type=jnp.float32)
    return y.astype(x.dtype)


if __name__ == "__main__":
    # Small config consistent with BrahmaConfig (scaled down).
    B, S = 2, 64            # batch, seq  -> M = 128 tokens
    H = 256                 # hidden_size
    I = 512                 # intermediate_size

    key = jax.random.PRNGKey(0)
    kx, kg, ku, kd = jax.random.split(key, 4)
    initializer_range = 0.02
    x = jax.random.normal(kx, (B, S, H), dtype=jnp.float32)
    w_gate = initializer_range * jax.random.normal(kg, (H, I), dtype=jnp.float32)
    w_up = initializer_range * jax.random.normal(ku, (H, I), dtype=jnp.float32)
    w_down = initializer_range * jax.random.normal(kd, (I, H), dtype=jnp.float32)

    y = brahma_mlp(x, w_gate, w_up, w_down)
    jax.block_until_ready(y)

    y_ref = _reference_bf16(x, w_gate, w_up, w_down)
    assert y.shape == (B, S, H)
    assert jnp.allclose(y, y_ref, atol=2e-3, rtol=2e-2), "mismatch vs reference"

    print("KERNEL_OK")
</pallas_src>

<mosaic_0001>
module attributes {stable_mosaic.version = 11 : i64} {
  func.func @_mlp_kernel(%arg0: i32, %arg1: i32, %arg2: memref<128x256xbf16, #tpu.memory_space<vmem>>, %arg3: memref<256x512xbf16, #tpu.memory_space<vmem>>, %arg4: memref<256x256xbf16, #tpu.memory_space<vmem>>, %arg5: memref<128x256xf32, #tpu.memory_space<vmem>>, %arg6: memref<128x256xf32, #tpu.memory_space<vmem>>) attributes {dimension_semantics = [#tpu.dimension_semantics<parallel>, #tpu.dimension_semantics<arbitrary>], iteration_bounds = array<i64: 1, 2>, scalar_prefetch = 0 : i64, scratch_operands = 1 : i64, tpu.core_type = #tpu.core_type<tc>, window_params = [{transform_indices = @transform_0, window_bounds = array<i64: 128, 256>}, {transform_indices = @transform_1, window_bounds = array<i64: 256, 512>}, {transform_indices = @transform_2, window_bounds = array<i64: 256, 256>}, {transform_indices = @transform_3, window_bounds = array<i64: 128, 256>}]} {
    %c0_i32 = arith.constant 0 : i32
    %0 = arith.cmpi eq, %arg1, %c0_i32 : i32
    %1 = arith.extui %0 : i1 to i32
    %c0_i32_0 = arith.constant 0 : i32
    %2 = arith.cmpi ne, %1, %c0_i32_0 : i32
    scf.if %2 {
      %cst_13 = arith.constant 0.000000e+00 : f32
      %24 = vector.broadcast %cst_13 : f32 to vector<128x256xf32>
      %c0_14 = arith.constant 0 : index
      %c0_15 = arith.constant 0 : index
      %25 = vector.load %arg6[%c0_14, %c0_15] : memref<128x256xf32, #tpu.memory_space<vmem>>, vector<128x256xf32>
      tpu.vector_store %arg6[%c0_14, %c0_15], %24 {strides = array<i32>} : memref<128x256xf32, #tpu.memory_space<vmem>>, vector<128x256xf32>,
    } else {
    }
    %c0 = arith.constant 0 : index
    %c0_1 = arith.constant 0 : index
    %3 = vector.load %arg2[%c0, %c0_1] : memref<128x256xbf16, #tpu.memory_space<vmem>>, vector<128x256xbf16>
    %c0_2 = arith.constant 0 : index
    %c0_3 = arith.constant 0 : index
    %4 = vector.load %arg3[%c0_2, %c0_3] : memref<256x512xbf16, #tpu.memory_space<vmem>>, vector<256x512xbf16>
    %cst = arith.constant dense<0.000000e+00> : vector<128x512xf32>
    %5 = tpu.matmul %3, %4, %cst {dimension_numbers = #tpu.dot_dimension_numbers<[1], [0], [0], [1], [0, 0, 1, 1], [], []>} : vector<128x256xbf16>, vector<256x512xbf16>, vector<128x512xf32> -> vector<128x512xf32>
    %6 = vector.extract_strided_slice %5 {offsets = [0, 0], sizes = [128, 256], strides = [1, 1]} : vector<128x512xf32> to vector<128x256xf32>
    %7 = vector.extract_strided_slice %5 {offsets = [0, 256], sizes = [128, 256], strides = [1, 1]} : vector<128x512xf32> to vector<128x256xf32>
    %8 = arith.negf %6 : vector<128x256xf32>
    %9 = math.exp %8 : vector<128x256xf32>
    %cst_4 = arith.constant 1.000000e+00 : f32
    %10 = vector.broadcast %cst_4 : f32 to vector<128x256xf32>
    %11 = arith.addf %10, %9 : vector<128x256xf32>
    %12 = arith.divf %10, %11 : vector<128x256xf32>
    %13 = arith.mulf %6, %12 : vector<128x256xf32>
    %14 = arith.mulf %13, %7 : vector<128x256xf32>
    %c0_5 = arith.constant 0 : index
    %c0_6 = arith.constant 0 : index
    %15 = vector.load %arg6[%c0_5, %c0_6] : memref<128x256xf32, #tpu.memory_space<vmem>>, vector<128x256xf32>
    %16 = arith.truncf %14 : vector<128x256xf32> to vector<128x256xbf16>
    %c0_7 = arith.constant 0 : index
    %c0_8 = arith.constant 0 : index
    %17 = vector.load %arg4[%c0_7, %c0_8] : memref<256x256xbf16, #tpu.memory_space<vmem>>, vector<256x256xbf16>
    %cst_9 = arith.constant dense<0.000000e+00> : vector<128x256xf32>
    %18 = tpu.matmul %16, %17, %cst_9 {dimension_numbers = #tpu.dot_dimension_numbers<[1], [0], [0], [1], [0, 0, 1, 1], [], []>} : vector<128x256xbf16>, vector<256x256xbf16>, vector<128x256xf32> -> vector<128x256xf32>
    %19 = arith.addf %15, %18 : vector<128x256xf32>
    %c0_10 = arith.constant 0 : index
    %c0_11 = arith.constant 0 : index
    %20 = vector.load %arg6[%c0_10, %c0_11] : memref<128x256xf32, #tpu.memory_space<vmem>>, vector<128x256xf32>
    tpu.vector_store %arg6[%c0_10, %c0_11], %19 {strides = array<i32>} : memref<128x256xf32, #tpu.memory_space<vmem>>, vector<128x256xf32>,
    %c1_i32 = arith.constant 1 : i32
    %21 = arith.cmpi eq, %arg1, %c1_i32 : i32
    %22 = arith.extui %21 : i1 to i32
    %c0_i32_12 = arith.constant 0 : i32
    %23 = arith.cmpi ne, %22, %c0_i32_12 : i32
    scf.if %23 {
      %c0_13 = arith.constant 0 : index
      %c0_14 = arith.constant 0 : index
      %24 = vector.load %arg6[%c0_13, %c0_14] : memref<128x256xf32, #tpu.memory_space<vmem>>, vector<128x256xf32>
      %c0_15 = arith.constant 0 : index
      %c0_16 = arith.constant 0 : index
      %25 = vector.load %arg5[%c0_15, %c0_16] : memref<128x256xf32, #tpu.memory_space<vmem>>, vector<128x256xf32>
      tpu.vector_store %arg5[%c0_15, %c0_16], %24 {strides = array<i32>} : memref<128x256xf32, #tpu.memory_space<vmem>>, vector<128x256xf32>,
    } else {
    }
    return
  }
  func.func @transform_0(%arg0: i32, %arg1: i32) -> (i32, i32) {
    %c0_i32 = arith.constant 0 : i32
    %c0_i32_0 = arith.constant 0 : i32
    return %arg0, %c0_i32 : i32, i32
  }
  func.func @transform_1(%arg0: i32, %arg1: i32) -> (i32, i32) {
    %c0_i32 = arith.constant 0 : i32
    %c0_i32_0 = arith.constant 0 : i32
    return %c0_i32, %arg1 : i32, i32
  }
  func.func @transform_2(%arg0: i32, %arg1: i32) -> (i32, i32) {
    %c0_i32 = arith.constant 0 : i32
    %c0_i32_0 = arith.constant 0 : i32
    return %arg1, %c0_i32 : i32, i32
  }
  func.func @transform_3(%arg0: i32, %arg1: i32) -> (i32, i32) {
    %c0_i32 = arith.constant 0 : i32
    %c0_i32_0 = arith.constant 0 : i32
    return %arg0, %c0_i32 : i32, i32
  }
}

</mosaic_0001>

<bundles_post_ra>
// kernel: tpu_custom_call.1
= control target key start
LH: loop header
LB: loop body
LE: loop exit
PB: predicated region body
PF: predicated region fallthrough
CT: control target
= control target key end

     0   :  { %8 = vsyncpa [#allocation4], 0  ;;  %s3188_s0 = inlined_call_operand.hbm [shape: bf16[128,256], index: 0, kind: input, shape index: {}]   ;;  %s3189_s1 = inlined_call_operand.hbm [shape: bf16[256,1024], index: 1, kind: input, shape index: {}]   ;;  %s3190_s2 = inlined_call_operand.hbm [shape: bf16[512,256], index: 2, kind: input, shape index: {}]   ;;  %s3191_s3 = inlined_call_operand.hbm [shape: f32[128,256], index: 3, kind: output, shape index: {}]  }
   0x1   :  { %9 = vsyncpa [#allocation7], 0 }
   0x2   :  { %11 = vsyncpa [#allocation7 + $0x1], 0 }
   0x3   :  { %12 = vsyncpa [#allocation5], 0  ;;  %s2639_s12 = smov 0   ;;  %s2641_s13 = smov 0  }
   0x4   :  { %s2643_s14 = smov 0   ;;  %s2645_s15 = smov 0  }
   0x5   :  { %s2647_s16 = smov 0   ;;  %s2649_s17 = smov 0  }
   0x6 LB: > { %s27_s18 = sadd.s32 1, %s2601_s16  ;;  %s63_s19 = sadd.s32 1, %s2593_s14  ;;  %s2605_s17 = sphi %s2649_s17, %s18_s17   ;;  %s2601_s16 = sphi %s2647_s16, %s3213_s16   ;;  %s2597_s15 = sphi %s2645_s15, %s3212_s15   ;;  %s2593_s14 = sphi %s2643_s14, %s3211_s14   ;;  %s2589_s13 = sphi %s2641_s13, %s3210_s13   ;;  %s2585_s12 = sphi %s2639_s12, %s3209_s12  }
   0x7   : > { %p28_p0 = scmp.ge.s32.totalorder %s27_s18, 2  ;;  %p70_p1 = scmp.ne.s32.totalorder %s2593_s14, %s2589_s13 }
   0x8   : > { %p71_p2 = scmp.eq.s32.totalorder %s2605_s17, 0  ;;  %p2075_p4 = scmp.lt.s32.totalorder %s2605_s17, 2 }
   0x9   : > { %s3215_s18 = smov (%p28_p0, %s27_s18), 0  ;;  %s169_s21 = sand.u32 1, %s2605_s17  }
   0xa   : > { %p72_p3 = por %p71_p2, %p70_p1  ;;  %s60_s20 = ssub.s32 %s2601_s16, %s3215_s18 }
   0xb   : > { %p61_p5 = scmp.eq.s32.totalorder %s60_s20, 0  ;;  %s171_s22 = sand.u32 1, %s2593_s14  }
   0xc   : > { %s2016_s23 = sshll.u32 %s2601_s16, 8  ;;  %s1855_s25 = sshll.u32 %s171_s22, 9 }
   0xd   : > { %s2683_s24 = scalar_select %p61_p5, %s2593_s14, %s63_s19  }
   0xe   : > { %s2690_s28 = scalar_lea.hbm %s3189_s1, %s2016_s23  ;;  %p2692_p6 = pnand %p2075_p4, %p72_p3 }
   0xf   : > { %s173_s30 = scalar_lea.vmem [#allocation6], %s1855_s25  ;;  %s2698_s5 = scalar_lea.sflag [#allocation7], %s169_s21 }
  0x10   : > { %s3198_s29 = scalar_select %p2692_p6, 1, 0 }
  0x11   : > { %s180_s4 = sshll.u32 %s173_s30, 4  ;;  %s2433_s6 = scalar_lea.hbm %s2690_s28, 8192  ;;  %s2696_s4 = int_to_ptr.vmem [resolvable:$true] %s180_s4 }
  0x12   : > { %p2434_p7 = scmp.ne.s32.totalorder %s2690_s28, %s2433_s6  ;;  %p3193_p8 = pneg %p2692_p6 }
  0x13   : > { %s2438_s9 = scalar_lea.hbm %s3189_s1, 16384  ;;  %p2439_p11 = scmp.lt.u32.totalorder %s2690_s28, %s3189_s1 }
  0x14   : > { %p2436_p9 = pnand %p3193_p8, %p2434_p7  ;;  %p2440_p12 = scmp.lt.u32.totalorder %s2438_s9, %s2433_s6 }
  0x15   : > { %p2442_p0 = scmp.lt.u32.totalorder %s2433_s6, %s2690_s28 }
  0x16   : > { %p2437_p10 = pneg %p2436_p9  ;;  %p2441_p13 = por %p2440_p12, %p2439_p11 }
  0x18   : > { %p2443_p1 = por %p2442_p0, %p2441_p13 }
  0x1a   : > { %p2444_p2 = pnand %p2443_p1, %p2437_p10 }
  0x1c   : > { %2447 = shalt.err (!%p2444_p2)
}
  0x1d   : > { %s2448_s19 = scalar_lea.vmem %s2696_s4, 8192  ;;  %s2607_s20 = smov [#allocation6]  }
  0x1e   : > { %p2449_p3 = scmp.ne.s32.totalorder %s2696_s4, %s2448_s19  ;;  %s2453_s21 = sshll.u32 %s2607_s20, 4  ;;  %s2454_s21 = int_to_ptr.vmem [resolvable:$false] %s2453_s21 }
  0x1f   : > { %s2455_s23 = scalar_lea.vmem %s2454_s21, 16384  ;;  %p2456_p7 = scmp.lt.s32.totalorder %s2696_s4, %s2454_s21 }
  0x20   : > { %p2451_p4 = pnand %p2449_p3, %p3193_p8  ;;  %p2457_p9 = scmp.lt.s32.totalorder %s2455_s23, %s2448_s19 }
  0x22   : > { %p2452_p5 = pneg %p2451_p4  ;;  %p2458_p11 = por %p2457_p9, %p2456_p7 }
  0x24   : > { %p2459_p12 = pnand %p2458_p11, %p2452_p5 }
  0x26   : > { %2462 = shalt.err (!%p2459_p12)
}
  0x27   : > { %s2608_s25 = smov 512   ;;  %s2609_s26 = smov 256  }
  0x28   : > { %s2610_s27 = smov 16   ;;  %s2727_s30 = sadd.s32 4294967295, %s2605_s17  }
  0x29   : > { %2070 = dma.hbm_to_vmem [thread:$0]  (!%p2692_p6), %s2690_s28, 8192, %s2696_s4, %s2698_s5, %s2608_s25, %s2609_s26, %s2610_s27  }
  0x2a   : > { %p76_p10 = scmp.ne.s32.totalorder %s2589_s13, %s2585_s12  ;;  %p3192_p13 = scmp.eq.s32.totalorder %s2727_s30, 0 }
  0x2b   : > { %p1852_p0 = scmp.ge.s32.totalorder %s2605_s17, 1  ;;  %p139_p1 = scmp.lt.s32.totalorder %s2605_s17, 3 }
  0x2c   : > { %p2736_p2 = por %p3192_p13, %p76_p10  ;;  %s2611_s28 = smov [#allocation3]  }
  0x2d   : > { %p2740_p3 = pnand %p1852_p0, %p139_p1  ;;  %s155_s4 = sshll.u32 %s2611_s28, 4  ;;  %s2744_s4 = int_to_ptr.vmem [resolvable:$true] %s155_s4 }
  0x2e   : > { %s3199_s6 = scalar_select %p2736_p2, 1, 0 }
  0x2f   : > { %s3200_s7 = scalar_select %p2740_p3, 1, 0 }
  0x30   : > { %p2063_p4 = pneg %p2740_p3  ;;  %s1858_s12 = sshll.u32 %s171_s22, 8 }
  0x31   : > { %s2018_s8 = sshll.u32 %s2601_s16, 12  ;;  %s194_s20 = scalar_lea.vmem [#allocation8], %s1858_s12 }
  0x32   : > { %p2753_p5 = pnand %p2063_p4, %p3192_p13  ;;  %s2760_s19 = scalar_lea.hbm %s3190_s2, %s2018_s8 }
  0x33   : > { %s202_s21 = sshll.u32 %s194_s20, 4  ;;  %s2463_s22 = scalar_lea.hbm %s3188_s0, 2048  ;;  %s2762_s21 = int_to_ptr.vmem [resolvable:$true] %s202_s21 }
  0x34   : > { %p2464_p7 = scmp.ne.s32.totalorder %s3188_s0, %s2463_s22  ;;  %p2465_p9 = pneg %p2753_p5 }
  0x35   : > { %p2470_p10 = scmp.lt.u32.totalorder %s2463_s22, %s3188_s0 }
  0x36   : > { %p2466_p11 = pnand %p2465_p9, %p2464_p7 }
  0x38   : > { %p2467_p12 = pneg %p2466_p11 }
  0x3a   : > { %p2472_p0 = pnand %p2470_p10, %p2467_p12 }
  0x3c   : > { %2475 = shalt.err (!%p2472_p0)
}
  0x3d   : > { %s2476_s12 = scalar_lea.vmem %s2744_s4, 2048  ;;  %p2484_p8 = scmp.lt.s32.totalorder %s2744_s4, %s2744_s4 }
  0x3e   : > { %p2477_p1 = scmp.ne.s32.totalorder %s2744_s4, %s2476_s12  ;;  %p2485_p2 = scmp.lt.s32.totalorder %s2476_s12, %s2476_s12 }
  0x40   : > { %p2479_p4 = pnand %p2477_p1, %p2465_p9  ;;  %p2486_p3 = por %p2485_p2, %p2484_p8 }
  0x42   : > { %p2480_p13 = pneg %p2479_p4 }
  0x44   : > { %p2487_p6 = pnand %p2486_p3, %p2480_p13 }
  0x46   : > { %2490 = shalt.err (!%p2487_p6)
}
  0x47   : > { %s2612_s8 = smov 128   ;;  %s2613_s11 = smov 8  }
  0x48   : > { %2066 = dma.hbm_to_vmem [thread:$0]  (!%p2753_p5), %s3188_s0, 2048, %s2744_s4, [#allocation4], %s2612_s8, %s2612_s8, %s2613_s11  }
  0x49   : > { %s2491_s25 = scalar_lea.hbm %s2760_s19, 4096  ;;  %p3202_p6 = scmp.ne.s32.totalorder %s3198_s29, 0 }
  0x4a   : > { %p2492_p8 = scmp.ne.s32.totalorder %s2760_s19, %s2491_s25  ;;  %s2496_s27 = scalar_lea.hbm %s3190_s2, 8192 }
  0x4b   : > { %p3203_p13 = pneg %p3202_p6  ;;  %p2497_p7 = scmp.lt.u32.totalorder %s2760_s19, %s3190_s2 }
  0x4c   : > { %p2498_p9 = scmp.lt.u32.totalorder %s2496_s27, %s2491_s25  ;;  %p2500_p12 = scmp.lt.u32.totalorder %s2491_s25, %s2760_s19 }
  0x4d   : > { %p2494_p2 = pnand %p2492_p8, %p3203_p13 }
  0x4e   : > { %p2499_p11 = por %p2498_p9, %p2497_p7 }
  0x4f   : > { %p2495_p3 = pneg %p2494_p2 }
  0x50   : > { %p2501_p10 = por %p2500_p12, %p2499_p11 }
  0x52   : > { %p2502_p0 = pnand %p2501_p10, %p2495_p3 }
  0x54   : > { %2505 = shalt.err (!%p2502_p0)
}
  0x55   : > { %s2506_s4 = scalar_lea.vmem %s2762_s21, 4096  ;;  %p3204_p1 = pmov %p3203_p13 }
  0x56   : > { %p2507_p5 = scmp.ne.s32.totalorder %s2762_s21, %s2506_s4  ;;  %s2614_s9 = smov [#allocation8]  }
  0x57   : > { %s2511_s12 = sshll.u32 %s2614_s9, 4  ;;  %s2512_s12 = int_to_ptr.vmem [resolvable:$false] %s2511_s12 }
  0x58   : > { %p2509_p4 = pnand %p2507_p5, %p3204_p1  ;;  %s2513_s20 = scalar_lea.vmem %s2512_s12, 8192 }
  0x59   : > { %p2514_p13 = scmp.lt.s32.totalorder %s2762_s21, %s2512_s12  ;;  %p2515_p2 = scmp.lt.s32.totalorder %s2513_s20, %s2506_s4 }
  0x5a   : > { %p2510_p8 = pneg %p2509_p4 }
  0x5b   : > { %p2516_p7 = por %p2515_p2, %p2514_p13 }
  0x5d   : > { %p2517_p9 = pnand %p2516_p7, %p2510_p8 }
  0x5f   : > { %2520 = shalt.err (!%p2517_p9)
}
  0x60   : > { %2073 = dma.hbm_to_vmem [thread:$0]  (!%p3202_p6), %s2760_s19, 4096, %s2762_s21, %s2698_s5, %s2612_s8, %s2612_s8, %s2613_s11  }
  0x61   : > { %p3205_p3 = scmp.ne.s32.totalorder %s3200_s7, 0 }
  0x62   : > { %p3206_p11 = scmp.eq.s32.totalorder (!%p3205_p3), %s2727_s30, 0 }
  0x63   : > { %214 = sbr.rel (%p3205_p3) target bundleno = 754 (0x2f2), region = 32 }
  0x6a   : > { %2572 = dma.done.wait (%p3206_p11), [#allocation4], 2048   ;;  %p3207_p12 = pmov %p3206_p11 }
  0x6b   : > { %s220_s29 = sand.u32 1, %s2727_s30   ;;  %s222_s23 = sand.u32 1, %s2589_s13  }
  0x6c   : > { %2574 = vsyncadd (%p3207_p12), [#allocation4], 4294965248  ;;  %s1864_s25 = sshll.u32 %s222_s23, 9  ;;  %s221_s22 = scalar_lea.sflag [#allocation7], %s220_s29 }
  0x6d   : > { %s2823_s26 = scalar_lea.vmem [#allocation6], %s1864_s25  ;;  %p3208_p10 = scmp.ne.s32.totalorder %s3199_s6, 0 }
  0x6f   : > { %2576 = dma.done.wait (%p3208_p10), %s221_s22, 12288  }
  0x70   : > { %2578 = vsyncadd (%p3208_p10), %s221_s22, 4294955008  ;;  %s1865_s5 = sshll.u32 %s222_s23, 8  ;;  %p1866_p6 = scmp.ne.s32.totalorder %s2597_s15, 0 }
  0x71   : > { %s2829_s7 = scalar_lea.vmem [#allocation8], %s1865_s5  ;;  %v2615_v0 = vmov (!%p1866_p6), 0.0  }
  0x72   : > { %263 = sbr.rel (%p1866_p6) target bundleno = 130 (0x82), region = 48  ;;  %264 = vst [vmem:[#allocation2] sm:$0xff] (!%p1866_p6), %v2615_v0  ;;  %265 = vst [vmem:[#allocation2 + $0x8] sm:$0xff] (!%p1866_p6), %v2615_v0 }
  0x73   : > { %266 = vst [vmem:[#allocation2 + $0x10] sm:$0xff] (!%p1866_p6), %v2615_v0  ;;  %267 = vst [vmem:[#allocation2 + $0x18] sm:$0xff] (!%p1866_p6), %v2615_v0 }
  0x74   : > { %268 = vst [vmem:[#allocation2 + $0x20] sm:$0xff] (!%p1866_p6), %v2615_v0  ;;  %269 = vst [vmem:[#allocation2 + $0x28] sm:$0xff] (!%p1866_p6), %v2615_v0 }
  0x75   : > { %270 = vst [vmem:[#allocation2 + $0x30] sm:$0xff] (!%p1866_p6), %v2615_v0  ;;  %271 = vst [vmem:[#allocation2 + $0x38] sm:$0xff] (!%p1866_p6), %v2615_v0 }
  0x76   : > { %272 = vst [vmem:[#allocation2 + $0x40] sm:$0xff] (!%p1866_p6), %v2615_v0  ;;  %273 = vst [vmem:[#allocation2 + $0x48] sm:$0xff] (!%p1866_p6), %v2615_v0 }
  0x77   : > { %274 = vst [vmem:[#allocation2 + $0x50] sm:$0xff] (!%p1866_p6), %v2615_v0  ;;  %275 = vst [vmem:[#allocation2 + $0x58] sm:$0xff] (!%p1866_p6), %v2615_v0 }
  0x78   : > { %276 = vst [vmem:[#allocation2 + $0x60] sm:$0xff] (!%p1866_p6), %v2615_v0  ;;  %277 = vst [vmem:[#allocation2 + $0x68] sm:$0xff] (!%p1866_p6), %v2615_v0 }
  0x79   : > { %278 = vst [vmem:[#allocation2 + $0x70] sm:$0xff] %v2615_v0  ;;  %279 = vst [vmem:[#allocation2 + $0x78] sm:$0xff] %v2615_v0 }
  0x7a   : > { %280 = vst [vmem:[#allocation2 + $0x80] sm:$0xff] %v2615_v0  ;;  %281 = vst [vmem:[#allocation2 + $0x88] sm:$0xff] %v2615_v0 }
  0x7b   : > { %282 = vst [vmem:[#allocation2 + $0x90] sm:$0xff] %v2615_v0  ;;  %283 = vst [vmem:[#allocation2 + $0x98] sm:$0xff] %v2615_v0 }
  0x7c   : > { %284 = vst [vmem:[#allocation2 + $0xa0] sm:$0xff] %v2615_v0  ;;  %285 = vst [vmem:[#allocation2 + $0xa8] sm:$0xff] %v2615_v0 }
  0x7d   : > { %286 = vst [vmem:[#allocation2 + $0xb0] sm:$0xff] %v2615_v0  ;;  %287 = vst [vmem:[#allocation2 + $0xb8] sm:$0xff] %v2615_v0 }
  0x7e   : > { %288 = vst [vmem:[#allocation2 + $0xc0] sm:$0xff] %v2615_v0  ;;  %289 = vst [vmem:[#allocation2 + $0xc8] sm:$0xff] %v2615_v0 }
  0x7f   : > { %290 = vst [vmem:[#allocation2 + $0xd0] sm:$0xff] %v2615_v0  ;;  %291 = vst [vmem:[#allocation2 + $0xd8] sm:$0xff] %v2615_v0 }
  0x80   : > { %292 = vst [vmem:[#allocation2 + $0xe0] sm:$0xff] %v2615_v0  ;;  %293 = vst [vmem:[#allocation2 + $0xe8] sm:$0xff] %v2615_v0 }
  0x81   : > { %294 = vst [vmem:[#allocation2 + $0xf0] sm:$0xff] %v2615_v0  ;;  %295 = vst [vmem:[#allocation2 + $0xf8] sm:$0xff] %v2615_v0 }
  0x82 PF: > { %v2137_v1 = vld [vmem:[%s2823_s26 + $0x4] ss:$16 sps:$4 sm:$0xff]   ;;  %v2139_v2 = vld [vmem:[%s2823_s26] ss:$16 sps:$4 sm:$0xff]   ;;  %v2158_v8 = vld [vmem:[%s2823_s26 + $0xc] ss:$16 sps:$4 sm:$0xff]  }
  0x83   : > { %776 = vmatprep.subr.bf16.mxu0 %v2137_v1  ;;  %v2140_v3 = vld [vmem:[%s2823_s26 + $0x24] ss:$16 sps:$4 sm:$0xff]   ;;  %v2142_v4 = vld [vmem:[%s2823_s26 + $0x20] ss:$16 sps:$4 sm:$0xff]   ;;  %v2160_v9 = vld [vmem:[%s2823_s26 + $0x8] ss:$16 sps:$4 sm:$0xff]   ;;  %889 = vmatprep.subr.bf16.mxu1 %v2158_v8 }
  0x84   : > { %777 = vmatpush1.bf16.msra.mxu0 %v2139_v2  ;;  %v2143_v5 = vld [vmem:[%s2823_s26 + $0x44] ss:$16 sps:$4 sm:$0xff]   ;;  %v2145_v6 = vld [vmem:[%s2823_s26 + $0x40] ss:$16 sps:$4 sm:$0xff]   ;;  %v2164_v12 = vld [vmem:[%s2823_s26 + $0x2c] ss:$16 sps:$4 sm:$0xff]   ;;  %890 = vmatpush1.bf16.msra.mxu1 %v2160_v9 }
  0x85   : > { %778 = vmatprep.subr.bf16.mxu0 %v2140_v3  ;;  %v2146_v7 = vld [vmem:[%s2823_s26 + $0x64] ss:$16 sps:$4 sm:$0xff]   ;;  %v2148_v10 = vld [vmem:[%s2823_s26 + $0x60] ss:$16 sps:$4 sm:$0xff]   ;;  %v2166_v13 = vld [vmem:[%s2823_s26 + $0x28] ss:$16 sps:$4 sm:$0xff]   ;;  %891 = vmatprep.subr.bf16.mxu1 %v2164_v12 }
  0x86   : > { %v2149_v11 = vld [vmem:[%s2823_s26 + $0x84] ss:$16 sps:$4 sm:$0xff]   ;;  %v2151_v14 = vld [vmem:[%s2823_s26 + $0x80] ss:$16 sps:$4 sm:$0xff]   ;;  %v2170_v15 = vld [vmem:[%s2823_s26 + $0x4c] ss:$16 sps:$4 sm:$0xff]  }
  0x87   : > { %v2152_v16 = vld [vmem:[%s2823_s26 + $0xa4] ss:$16 sps:$4 sm:$0xff]   ;;  %v2172_v17 = vld [vmem:[%s2823_s26 + $0x48] ss:$16 sps:$4 sm:$0xff]   ;;  %v2176_v18 = vld [vmem:[%s2823_s26 + $0x6c] ss:$16 sps:$4 sm:$0xff]  }
  0x88   : > { %779 = vmatpush1.bf16.msra.mxu0 %v2142_v4  ;;  %892 = vmatpush1.bf16.msra.mxu1 %v2166_v13  ;;  %v2154_v19 = vld [vmem:[%s2823_s26 + $0xa0] ss:$16 sps:$4 sm:$0xff]   ;;  %v2155_v20 = vld [vmem:[%s2823_s26 + $0xc4] ss:$16 sps:$4 sm:$0xff]   ;;  %v2178_v21 = vld [vmem:[%s2823_s26 + $0x68] ss:$16 sps:$4 sm:$0xff]  }
  0x89   : > { %780 = vmatprep.subr.bf16.mxu0 %v2143_v5  ;;  %893 = vmatprep.subr.bf16.mxu1 %v2170_v15  ;;  %v2182_v22 = vld [vmem:[%s2823_s26 + $0x8c] ss:$16 sps:$4 sm:$0xff]   ;;  %v2157_v23 = vld [vmem:[%s2823_s26 + $0xc0] ss:$16 sps:$4 sm:$0xff]   ;;  %v2161_v24 = vld [vmem:[%s2823_s26 + $0xe4] ss:$16 sps:$4 sm:$0xff]  }
  0x8a   : > { %v2184_v25 = vld [vmem:[%s2823_s26 + $0x88] ss:$16 sps:$4 sm:$0xff]   ;;  %v2188_v26 = vld [vmem:[%s2823_s26 + $0xac] ss:$16 sps:$4 sm:$0xff]   ;;  %v2163_v27 = vld [vmem:[%s2823_s26 + $0xe0] ss:$16 sps:$4 sm:$0xff]  }
  0x8b   : > { %v2167_v28 = vld [vmem:[%s2823_s26 + $0x104] ss:$16 sps:$4 sm:$0xff]   ;;  %v2190_v29 = vld [vmem:[%s2823_s26 + $0xa8] ss:$16 sps:$4 sm:$0xff]   ;;  %v2194_v30 = vld [vmem:[%s2823_s26 + $0xcc] ss:$16 sps:$4 sm:$0xff]  }
  0x8c   : > { %781 = vmatpush1.bf16.msra.mxu0 %v2145_v6  ;;  %894 = vmatpush1.bf16.msra.mxu1 %v2172_v17  ;;  %v2169_v31 = vld [vmem:[%s2823_s26 + $0x100] ss:$16 sps:$4 sm:$0xff]   ;;  %v2173_v32 = vld [vmem:[%s2823_s26 + $0x124] ss:$16 sps:$4 sm:$0xff]   ;;  %v2196_v33 = vld [vmem:[%s2823_s26 + $0xc8] ss:$16 sps:$4 sm:$0xff]  }
  0x8d   : > { %782 = vmatprep.subr.bf16.mxu0 %v2146_v7  ;;  %895 = vmatprep.subr.bf16.mxu1 %v2176_v18  ;;  %v2200_v34 = vld [vmem:[%s2823_s26 + $0xec] ss:$16 sps:$4 sm:$0xff]   ;;  %v2175_v35 = vld [vmem:[%s2823_s26 + $0x120] ss:$16 sps:$4 sm:$0xff]   ;;  %v2179_v37 = vld [vmem:[%s2823_s26 + $0x144] ss:$16 sps:$4 sm:$0xff]  }
  0x8e   : > { %v2217_v36 = vld [vmem:[#allocation3 + $0x4] ss:$8 sps:$4 sm:$0xff]   ;;  %v2202_v38 = vld [vmem:[%s2823_s26 + $0xe8] ss:$16 sps:$4 sm:$0xff]   ;;  %v2181_v40 = vld [vmem:[%s2823_s26 + $0x140] ss:$16 sps:$4 sm:$0xff]  }
  0x8f   : > { %808 = vmatprep.mubr.bf16.mxu0 %v2217_v36  ;;  %v2206_v39 = vld [vmem:[%s2823_s26 + $0x10c] ss:$16 sps:$4 sm:$0xff]   ;;  %921 = vmatprep.mubr.bf16.mxu1 %v2217_v36  ;;  %v2185_v41 = vld [vmem:[%s2823_s26 + $0x164] ss:$16 sps:$4 sm:$0xff]   ;;  %v2208_v42 = vld [vmem:[%s2823_s26 + $0x108] ss:$16 sps:$4 sm:$0xff]  }
  0x90   : > { %783 = vmatpush1.bf16.msra.mxu0 %v2148_v10  ;;  %896 = vmatpush1.bf16.msra.mxu1 %v2178_v21  ;;  %v2212_v43 = vld [vmem:[%s2823_s26 + $0x12c] ss:$16 sps:$4 sm:$0xff]   ;;  %v2187_v44 = vld [vmem:[%s2823_s26 + $0x160] ss:$16 sps:$4 sm:$0xff]   ;;  %v2191_v45 = vld [vmem:[%s2823_s26 + $0x184] ss:$16 sps:$4 sm:$0xff]  }
  0x91   : > { %784 = vmatprep.subr.bf16.mxu0 %v2149_v11  ;;  %897 = vmatprep.subr.bf16.mxu1 %v2182_v22  ;;  %v2214_v46 = vld [vmem:[%s2823_s26 + $0x128] ss:$16 sps:$4 sm:$0xff]   ;;  %v2218_v47 = vld [vmem:[%s2823_s26 + $0x14c] ss:$16 sps:$4 sm:$0xff]   ;;  %v2193_v48 = vld [vmem:[%s2823_s26 + $0x180] ss:$16 sps:$4 sm:$0xff]  }
  0x92   : > { %v2197_v49 = vld [vmem:[%s2823_s26 + $0x1a4] ss:$16 sps:$4 sm:$0xff]   ;;  %v2220_v50 = vld [vmem:[%s2823_s26 + $0x148] ss:$16 sps:$4 sm:$0xff]   ;;  %v2221_v51 = vld [vmem:[%s2823_s26 + $0x16c] ss:$16 sps:$4 sm:$0xff]  }
  0x93   : > { %v2199_v52 = vld [vmem:[%s2823_s26 + $0x1a0] ss:$16 sps:$4 sm:$0xff]   ;;  %v2203_v53 = vld [vmem:[%s2823_s26 + $0x1c4] ss:$16 sps:$4 sm:$0xff]   ;;  %v2223_v54 = vld [vmem:[%s2823_s26 + $0x168] ss:$16 sps:$4 sm:$0xff]  }
  0x94   : > { %785 = vmatpush1.bf16.msra.mxu0 %v2151_v14  ;;  %898 = vmatpush1.bf16.msra.mxu1 %v2184_v25  ;;  %v2227_v55 = vld [vmem:[%s2823_s26 + $0x18c] ss:$16 sps:$4 sm:$0xff]   ;;  %v2205_v56 = vld [vmem:[%s2823_s26 + $0x1c0] ss:$16 sps:$4 sm:$0xff]   ;;  %v2209_v57 = vld [vmem:[%s2823_s26 + $0x1e4] ss:$16 sps:$4 sm:$0xff]  }
  0x95   : > { %786 = vmatprep.subr.bf16.mxu0 %v2152_v16  ;;  %899 = vmatprep.subr.bf16.mxu1 %v2188_v26  ;;  %v2229_v58 = vld [vmem:[%s2823_s26 + $0x188] ss:$16 sps:$4 sm:$0xff]   ;;  %v2230_v59 = vld [vmem:[%s2823_s26 + $0x1ac] ss:$16 sps:$4 sm:$0xff]   ;;  %v2211_v60 = vld [vmem:[%s2823_s26 + $0x1e0] ss:$16 sps:$4 sm:$0xff]  }
  0x96   : > { %v2232_v61 = vld [vmem:[%s2823_s26 + $0x1a8] ss:$16 sps:$4 sm:$0xff]   ;;  %v2259_v63 = vld [vmem:[%s2829_s7 + $0x4] ss:$8 sps:$4 sm:$0xff]   ;;  %v2224_v0 = vld [vmem:[#allocation3 + $0x14] ss:$8 sps:$4 sm:$0xff]  }
  0x97   : > { %v2215_v62 = vld [vmem:[#allocation3] ss:$8 sps:$4 sm:$0xff]   ;;  %v2236_v1 = vld [vmem:[%s2823_s26 + $0x1cc] ss:$16 sps:$4 sm:$0xff]   ;;  %v2260_v6 = vld [vmem:[%s2829_s7 + $0x10] ss:$8 sps:$4 sm:$0xff]  }
  0x98   : > { %787 = vmatpush1.bf16.msra.mxu0 %v2154_v19  ;;  %900 = vmatpush1.bf16.msra.mxu1 %v2190_v29  ;;  %v2257_v2 = vld [vmem:[%s2829_s7] ss:$8 sps:$4 sm:$0xff]   ;;  %v2262_v3 = vld [vmem:[%s2829_s7 + $0x14] ss:$8 sps:$4 sm:$0xff]   ;;  %v2265_v7 = vld [vmem:[%s2829_s7 + $0x24] ss:$8 sps:$4 sm:$0xff]  }
  0x99   : > { %788 = vmatprep.subr.bf16.mxu0 %v2155_v20  ;;  %901 = vmatprep.subr.bf16.mxu1 %v2194_v30  ;;  %v2238_v4 = vld [vmem:[%s2823_s26 + $0x1c8] ss:$16 sps:$4 sm:$0xff]   ;;  %v2239_v5 = vld [vmem:[%s2823_s26 + $0x1ec] ss:$16 sps:$4 sm:$0xff]   ;;  %p2011_p0 = scmp.ne.s32.totalorder %s2597_s15, 1 }
  0x9a   : > { %v2241_v8 = vld [vmem:[%s2823_s26 + $0x1e8] ss:$16 sps:$4 sm:$0xff]   ;;  %v2233_v10 = vld [vmem:[#allocation3 + $0x24] ss:$8 sps:$4 sm:$0xff]   ;;  %v2268_v12 = vld [vmem:[%s2829_s7 + $0x34] ss:$8 sps:$4 sm:$0xff]  }
  0x9b   : > { %v2226_v9 = vld [vmem:[#allocation3 + $0x10] ss:$8 sps:$4 sm:$0xff]   ;;  %v2263_v11 = vld [vmem:[%s2829_s7 + $0x20] ss:$8 sps:$4 sm:$0xff]   ;;  %v2271_v14 = vld [vmem:[%s2829_s7 + $0x44] ss:$8 sps:$4 sm:$0xff]  }
  0x9c   : > { %789 = vmatpush1.bf16.msra.mxu0 %v2157_v23  ;;  %902 = vmatpush1.bf16.msra.mxu1 %v2196_v33  ;;  %v2266_v13 = vld [vmem:[%s2829_s7 + $0x30] ss:$8 sps:$4 sm:$0xff]   ;;  %v2235_v15 = vld [vmem:[#allocation3 + $0x20] ss:$8 sps:$4 sm:$0xff]   ;;  %v2242_v16 = vld [vmem:[#allocation3 + $0x34] ss:$8 sps:$4 sm:$0xff]  }
  0x9d   : > { %790 = vmatprep.subr.bf16.mxu0 %v2161_v24  ;;  %903 = vmatprep.subr.bf16.mxu1 %v2200_v34  ;;  %v2269_v17 = vld [vmem:[%s2829_s7 + $0x40] ss:$8 sps:$4 sm:$0xff]   ;;  %v2274_v18 = vld [vmem:[%s2829_s7 + $0x54] ss:$8 sps:$4 sm:$0xff]   ;;  %v2272_v19 = vld [vmem:[%s2829_s7 + $0x50] ss:$8 sps:$4 sm:$0xff]  }
  0x9e   : > { %v2277_v20 = vld [vmem:[%s2829_s7 + $0x64] ss:$8 sps:$4 sm:$0xff]   ;;  %v2244_v21 = vld [vmem:[#allocation3 + $0x30] ss:$8 sps:$4 sm:$0xff]   ;;  %v2275_v23 = vld [vmem:[%s2829_s7 + $0x60] ss:$8 sps:$4 sm:$0xff]  }
  0x9f   : > { %v2245_v22 = vld [vmem:[#allocation3 + $0x44] ss:$8 sps:$4 sm:$0xff]   ;;  %v2247_v24 = vld [vmem:[#allocation3 + $0x40] ss:$8 sps:$4 sm:$0xff]   ;;  %v2248_v25 = vld [vmem:[#allocation3 + $0x54] ss:$8 sps:$4 sm:$0xff]  }
  0xa0   : > { %791 = vmatpush1.bf16.msra.mxu0 %v2163_v27  ;;  %904 = vmatpush1.bf16.msra.mxu1 %v2202_v38  ;;  %v2250_v26 = vld [vmem:[#allocation3 + $0x50] ss:$8 sps:$4 sm:$0xff]   ;;  %v2251_v27 = vld [vmem:[#allocation3 + $0x64] ss:$8 sps:$4 sm:$0xff]   ;;  %v2254_v29 = vld [vmem:[#allocation3 + $0x74] ss:$8 sps:$4 sm:$0xff]  }
  0xa1   : > { %792 = vmatprep.subr.bf16.mxu0 %v2167_v28  ;;  %905 = vmatprep.subr.bf16.mxu1 %v2206_v39  ;;  %v2253_v28 = vld [vmem:[#allocation3 + $0x60] ss:$8 sps:$4 sm:$0xff]   ;;  %v2256_v30 = vld [vmem:[#allocation3 + $0x70] ss:$8 sps:$4 sm:$0xff]   ;;  %v2283_v33 = vld [vmem:[%s2829_s7 + $0x84] ss:$8 sps:$4 sm:$0xff]  }
  0xa2   : > { %v2281_v34 = vld [vmem:[%s2829_s7 + $0x80] ss:$8 sps:$4 sm:$0xff]   ;;  %v2284_v36 = vld [vmem:[%s2829_s7 + $0x90] ss:$8 sps:$4 sm:$0xff]   ;;  %v2292_v39 = vld [vmem:[%s2829_s7 + $0xb4] ss:$8 sps:$4 sm:$0xff]  }
  0xa3   : > { %v2287_v38 = vld [vmem:[%s2829_s7 + $0xa0] ss:$8 sps:$4 sm:$0xff]  }
  0xa4   : > { %793 = vmatpush1.bf16.msra.mxu0 %v2169_v31  ;;  %906 = vmatpush1.bf16.msra.mxu1 %v2208_v42  ;;  %v2280_v31 = vld [vmem:[%s2829_s7 + $0x74] ss:$8 sps:$4 sm:$0xff]   ;;  %v2293_v42 = vld [vmem:[%s2829_s7 + $0xc0] ss:$8 sps:$4 sm:$0xff]  }
  0xa5   : > { %794 = vmatprep.subr.bf16.mxu0 %v2173_v32  ;;  %907 = vmatprep.subr.bf16.mxu1 %v2212_v43  ;;  %v2278_v32 = vld [vmem:[%s2829_s7 + $0x70] ss:$8 sps:$4 sm:$0xff]   ;;  %v2298_v43 = vld [vmem:[%s2829_s7 + $0xd4] ss:$8 sps:$4 sm:$0xff]  }
  0xa8   : > { %795 = vmatpush1.bf16.msra.mxu0 %v2175_v35  ;;  %908 = vmatpush1.bf16.msra.mxu1 %v2214_v46  ;;  %v2286_v35 = vld [vmem:[%s2829_s7 + $0x94] ss:$8 sps:$4 sm:$0xff]   ;;  %v2299_v46 = vld [vmem:[%s2829_s7 + $0xe0] ss:$8 sps:$4 sm:$0xff]  }
  0xa9   : > { %796 = vmatprep.subr.bf16.mxu0 %v2179_v37  ;;  %909 = vmatprep.subr.bf16.mxu1 %v2218_v47  ;;  %v2289_v37 = vld [vmem:[%s2829_s7 + $0xa4] ss:$8 sps:$4 sm:$0xff]   ;;  %v2304_v47 = vld [vmem:[%s2829_s7 + $0xf4] ss:$8 sps:$4 sm:$0xff]  }
  0xac   : > { %797 = vmatpush1.bf16.msra.mxu0 %v2181_v40  ;;  %910 = vmatpush1.bf16.msra.mxu1 %v2220_v50  ;;  %v2290_v40 = vld [vmem:[%s2829_s7 + $0xb0] ss:$8 sps:$4 sm:$0xff]  }
  0xad   : > { %798 = vmatprep.subr.bf16.mxu0 %v2185_v41  ;;  %911 = vmatprep.subr.bf16.mxu1 %v2221_v51  ;;  %v2295_v41 = vld [vmem:[%s2829_s7 + $0xc4] ss:$8 sps:$4 sm:$0xff]  }
  0xb0   : > { %799 = vmatpush1.bf16.msra.mxu0 %v2187_v44  ;;  %912 = vmatpush1.bf16.msra.mxu1 %v2223_v54  ;;  %v2296_v44 = vld [vmem:[%s2829_s7 + $0xd0] ss:$8 sps:$4 sm:$0xff]  }
  0xb1   : > { %800 = vmatprep.subr.bf16.mxu0 %v2191_v45  ;;  %913 = vmatprep.subr.bf16.mxu1 %v2227_v55  ;;  %v2301_v45 = vld [vmem:[%s2829_s7 + $0xe4] ss:$8 sps:$4 sm:$0xff]  }
  0xb4   : > { %801 = vmatpush1.bf16.msra.mxu0 %v2193_v48  ;;  %914 = vmatpush1.bf16.msra.mxu1 %v2229_v58  ;;  %v2302_v48 = vld [vmem:[%s2829_s7 + $0xf0] ss:$8 sps:$4 sm:$0xff]  }
  0xb5   : > { %802 = vmatprep.subr.bf16.mxu0 %v2197_v49  ;;  %915 = vmatprep.subr.bf16.mxu1 %v2230_v59 }
  0xb8   : > { %803 = vmatpush1.bf16.msra.mxu0 %v2199_v52  ;;  %916 = vmatpush1.bf16.msra.mxu1 %v2232_v61 }
  0xb9   : > { %804 = vmatprep.subr.bf16.mxu0 %v2203_v53  ;;  %917 = vmatprep.subr.bf16.mxu1 %v2236_v1 }
  0xbc   : > { %805 = vmatpush1.bf16.msra.mxu0 %v2205_v56  ;;  %918 = vmatpush1.bf16.msra.mxu1 %v2238_v4 }
  0xbd   : > { %806 = vmatprep.subr.bf16.mxu0 %v2209_v57  ;;  %919 = vmatprep.subr.bf16.mxu1 %v2239_v5 }
  0xc0   : > { %807 = vmatpush1.bf16.msra.mxu0 %v2211_v60  ;;  %920 = vmatpush1.bf16.msra.mxu1 %v2241_v8 }
  0xc1   : > { %1498 = vmatprep.subr.bf16.mxu0 %v2259_v63  ;;  %2019 = vmatprep.subr.bf16.mxu1 %v2259_v63 }
  0xc3   : > { %809 = vmatmul.mubr.bf16.vlgmr.msra.gmra.mrb[0].mxu0 %v2215_v62  ;;  %922 = vmatmul.mubr.bf16.vlgmr.msra.gmra.mrb[0].mxu1 %v2215_v62 }
  0xc4   : > { %818 = vmatprep.mubr.bf16.mxu0 %v2224_v0  ;;  %1499 = vmatpush1.bf16.msra.mxu0 %v2257_v2 }
  0xc5   : > { %1500 = vmatprep.subr.bf16.mxu0 %v2262_v3  ;;  %931 = vmatprep.mubr.bf16.mxu1 %v2224_v0 }
  0xc6   : > { %2035 = vmatpush1.bf16.msra.mxu1 %v2257_v2 }
  0xc7   : > { %2020 = vmatprep.subr.bf16.mxu1 %v2262_v3 }
  0xc8   : > { %1501 = vmatpush1.bf16.msra.mxu0 %v2260_v6 }
  0xc9   : > { %1502 = vmatprep.subr.bf16.mxu0 %v2265_v7 }
  0xca   : > { %2036 = vmatpush1.bf16.msra.mxu1 %v2260_v6 }
  0xcb   : > { %819 = vmatmul.mubr.bf16.gmra.mrb[4].mxu0 %v2226_v9  ;;  %2021 = vmatprep.subr.bf16.mxu1 %v2265_v7 }
  0xcc   : > { %828 = vmatprep.mubr.bf16.mxu0 %v2233_v10  ;;  %1503 = vmatpush1.bf16.msra.mxu0 %v2263_v11 }
  0xcd   : > { %1504 = vmatprep.subr.bf16.mxu0 %v2268_v12  ;;  %932 = vmatmul.mubr.bf16.gmra.mrb[4].mxu1 %v2226_v9 }
  0xce   : > { %941 = vmatprep.mubr.bf16.mxu1 %v2233_v10  ;;  %2037 = vmatpush1.bf16.msra.mxu1 %v2263_v11 }
  0xcf   : > { %2022 = vmatprep.subr.bf16.mxu1 %v2268_v12 }
  0xd0   : > { %1505 = vmatpush1.bf16.msra.mxu0 %v2266_v13 }
  0xd1   : > { %1506 = vmatprep.subr.bf16.mxu0 %v2271_v14 }
  0xd2   : > { %2038 = vmatpush1.bf16.msra.mxu1 %v2266_v13 }
  0xd3   : > { %829 = vmatmul.mubr.bf16.gmra.mrb[8].mxu0 %v2235_v15  ;;  %2023 = vmatprep.subr.bf16.mxu1 %v2271_v14 }
  0xd4   : > { %838 = vmatprep.mubr.bf16.mxu0 %v2242_v16  ;;  %1507 = vmatpush1.bf16.msra.mxu0 %v2269_v17 }
  0xd5   : > { %1508 = vmatprep.subr.bf16.mxu0 %v2274_v18  ;;  %942 = vmatmul.mubr.bf16.gmra.mrb[8].mxu1 %v2235_v15 }
  0xd6   : > { %951 = vmatprep.mubr.bf16.mxu1 %v2242_v16  ;;  %2039 = vmatpush1.bf16.msra.mxu1 %v2269_v17 }
  0xd7   : > { %2024 = vmatprep.subr.bf16.mxu1 %v2274_v18 }
  0xd8   : > { %1509 = vmatpush1.bf16.msra.mxu0 %v2272_v19 }
  0xd9   : > { %1510 = vmatprep.subr.bf16.mxu0 %v2277_v20 }
  0xda   : > { %2040 = vmatpush1.bf16.msra.mxu1 %v2272_v19 }
  0xdb   : > { %839 = vmatmul.mubr.bf16.gmra.mrb[12].mxu0 %v2244_v21  ;;  %2025 = vmatprep.subr.bf16.mxu1 %v2277_v20 }
  0xdc   : > { %848 = vmatprep.mubr.bf16.mxu0 %v2245_v22  ;;  %1511 = vmatpush1.bf16.msra.mxu0 %v2275_v23 }
  0xdd   : > { %952 = vmatmul.mubr.bf16.gmra.mrb[12].mxu1 %v2244_v21  ;;  %1512 = vmatprep.subr.bf16.mxu0 %v2280_v31 }
  0xde   : > { %961 = vmatprep.mubr.bf16.mxu1 %v2245_v22  ;;  %2041 = vmatpush1.bf16.msra.mxu1 %v2275_v23 }
  0xdf   : > { %2026 = vmatprep.subr.bf16.mxu1 %v2280_v31 }
  0xe0   : > { %1513 = vmatpush1.bf16.msra.mxu0 %v2278_v32 }
  0xe1   : > { %1514 = vmatprep.subr.bf16.mxu0 %v2283_v33 }
  0xe2   : > { %2042 = vmatpush1.bf16.msra.mxu1 %v2278_v32 }
  0xe3   : > { %849 = vmatmul.mubr.bf16.gmra.mrb[16].mxu0 %v2247_v24  ;;  %2027 = vmatprep.subr.bf16.mxu1 %v2283_v33 }
  0xe4   : > { %858 = vmatprep.mubr.bf16.mxu0 %v2248_v25  ;;  %1515 = vmatpush1.bf16.msra.mxu0 %v2281_v34 }
  0xe5   : > { %962 = vmatmul.mubr.bf16.gmra.mrb[16].mxu1 %v2247_v24  ;;  %1516 = vmatprep.subr.bf16.mxu0 %v2286_v35 }
  0xe6   : > { %971 = vmatprep.mubr.bf16.mxu1 %v2248_v25  ;;  %2043 = vmatpush1.bf16.msra.mxu1 %v2281_v34 }
  0xe7   : > { %2028 = vmatprep.subr.bf16.mxu1 %v2286_v35 }
  0xe8   : > { %1517 = vmatpush1.bf16.msra.mxu0 %v2284_v36 }
  0xe9   : > { %1518 = vmatprep.subr.bf16.mxu0 %v2289_v37 }
  0xea   : > { %2044 = vmatpush1.bf16.msra.mxu1 %v2284_v36 }
  0xeb   : > { %859 = vmatmul.mubr.bf16.gmra.mrb[20].mxu0 %v2250_v26  ;;  %2029 = vmatprep.subr.bf16.mxu1 %v2289_v37 }
  0xec   : > { %868 = vmatprep.mubr.bf16.mxu0 %v2251_v27  ;;  %1519 = vmatpush1.bf16.msra.mxu0 %v2287_v38 }
  0xed   : > { %972 = vmatmul.mubr.bf16.gmra.mrb[20].mxu1 %v2250_v26  ;;  %1520 = vmatprep.subr.bf16.mxu0 %v2292_v39 }
  0xee   : > { %981 = vmatprep.mubr.bf16.mxu1 %v2251_v27  ;;  %2045 = vmatpush1.bf16.msra.mxu1 %v2287_v38 }
  0xef   : > { %2030 = vmatprep.subr.bf16.mxu1 %v2292_v39 }
  0xf0   : > { %1521 = vmatpush1.bf16.msra.mxu0 %v2290_v40 }
  0xf1   : > { %1522 = vmatprep.subr.bf16.mxu0 %v2295_v41 }
  0xf2   : > { %2046 = vmatpush1.bf16.msra.mxu1 %v2290_v40 }
  0xf3   : > { %869 = vmatmul.mubr.bf16.gmra.mrb[24].mxu0 %v2253_v28  ;;  %2031 = vmatprep.subr.bf16.mxu1 %v2295_v41 }
  0xf4   : > { %878 = vmatprep.mubr.bf16.mxu0 %v2254_v29  ;;  %1523 = vmatpush1.bf16.msra.mxu0 %v2293_v42 }
  0xf5   : > { %982 = vmatmul.mubr.bf16.gmra.mrb[24].mxu1 %v2253_v28  ;;  %1524 = vmatprep.subr.bf16.mxu0 %v2298_v43 }
  0xf6   : > { %991 = vmatprep.mubr.bf16.mxu1 %v2254_v29  ;;  %2047 = vmatpush1.bf16.msra.mxu1 %v2293_v42 }
  0xf7   : > { %2032 = vmatprep.subr.bf16.mxu1 %v2298_v43 }
  0xf8   : > { %1525 = vmatpush1.bf16.msra.mxu0 %v2296_v44 }
  0xf9   : > { %1526 = vmatprep.subr.bf16.mxu0 %v2301_v45 }
  0xfa   : > { %2048 = vmatpush1.bf16.msra.mxu1 %v2296_v44 }
  0xfb   : > { %879 = vmatmul.mubr.bf16.gmra.mrb[28].mxu0 %v2256_v30  ;;  %2033 = vmatprep.subr.bf16.mxu1 %v2301_v45 }
  0xfc   : > { %1527 = vmatpush1.bf16.msra.mxu0 %v2299_v46 }
  0xfd   : > { %992 = vmatmul.mubr.bf16.gmra.mrb[28].mxu1 %v2256_v30  ;;  %1528 = vmatprep.subr.bf16.mxu0 %v2304_v47 }
  0xfe   : > { %2049 = vmatpush1.bf16.msra.mxu1 %v2299_v46 }
  0xff   : > { %2034 = vmatprep.subr.bf16.mxu1 %v2304_v47 }
 0x100   : > { %1529 = vmatpush1.bf16.msra.mxu0 %v2302_v48 }
 0x102   : > { %2050 = vmatpush1.bf16.msra.mxu1 %v2302_v48 }
 0x196   : > { %v2928_v49 = vpop.f32.mrb[0].mxu0  ;;  %v2948_v62 = vpop.f32.mrb[0].mxu1 }
 0x197   : > { %v1947_v50 = vmul.f32 -1.442695, %v2928_v49  ;;  %v2931_v51 = vpop.f32.mrb[1].mxu0  ;;  %v2953_v1 = vpop.f32.mrb[1].mxu1 }
 0x198   : > { %v1948_v52 = vmul.f32 -1.442695, %v2931_v51  ;;  %v2934_v53 = vpop.f32.mrb[2].mxu0  ;;  %v2956_v3 = vpop.f32.mrb[2].mxu1 }
 0x199   : > { %2305 = vpow2.f32 %v1947_v50  ;;  %v1949_v54 = vmul.f32 -1.442695, %v2934_v53  ;;  %v2937_v55 = vpop.f32.mrb[3].mxu0  ;;  %v2958_v5 = vpop.f32.mrb[3].mxu1 }
 0x19a   : > { %2307 = vpow2.f32 %v1948_v52  ;;  %v1950_v56 = vmul.f32 -1.442695, %v2937_v55 }
 0x19b   : > { %2309 = vpow2.f32 %v1949_v54 }
 0x19c   : > { %2311 = vpow2.f32 %v1950_v56 }
 0x19e   : > { %v2940_v57 = vpop.f32.mrb[4].mxu0 }
 0x19f   : > { %v1951_v58 = vmul.f32 -1.442695, %v2940_v57  ;;  %v2943_v59 = vpop.f32.mrb[5].mxu0 }
 0x1a0   : > { %v1952_v60 = vmul.f32 -1.442695, %v2943_v59  ;;  %v2946_v61 = vpop.f32.mrb[6].mxu0  ;;  %v2968_v18 = vpop.f32.mrb[4].mxu1 }
 0x1a1   : > { %2313 = vpow2.f32 %v1951_v58  ;;  %v1953_v63 = vmul.f32 -1.442695, %v2946_v61  ;;  %v2951_v0 = vpop.f32.mrb[7].mxu0  ;;  %v2973_v21 = vpop.f32.mrb[5].mxu1 }
 0x1a2   : > { %2315 = vpow2.f32 %v1952_v60  ;;  %v1954_v2 = vmul.f32 -1.442695, %v2951_v0  ;;  %v2976_v23 = vpop.f32.mrb[6].mxu1 }
 0x1a3   : > { %v2306_v4 = vpop.eup %2305  ;;  %2317 = vpow2.f32 %v1953_v63  ;;  %v2978_v25 = vpop.f32.mrb[7].mxu1 }
 0x1a4   : > { %v2308_v6 = vpop.eup %2307  ;;  %v1098_v7 = vadd.f32 1.0, %v2306_v4  ;;  %2319 = vpow2.f32 %v1954_v2 }
 0x1a5   : > { %v2310_v8 = vpop.eup %2309  ;;  %v1099_v9 = vadd.f32 1.0, %v2308_v6 }
 0x1a6   : > { %v2312_v10 = vpop.eup %2311  ;;  %2321 = vrcp.f32 %v1098_v7  ;;  %v1100_v11 = vadd.f32 1.0, %v2310_v8  ;;  %v2960_v12 = vpop.f32.mrb[8].mxu0 }
 0x1a7   : > { %2323 = vrcp.f32 %v1099_v9  ;;  %v1101_v13 = vadd.f32 1.0, %v2312_v10  ;;  %v1955_v14 = vmul.f32 -1.442695, %v2960_v12  ;;  %v2963_v15 = vpop.f32.mrb[9].mxu0 }
 0x1a8   : > { %2325 = vrcp.f32 %v1100_v11  ;;  %v1956_v16 = vmul.f32 -1.442695, %v2963_v15  ;;  %v2966_v17 = vpop.f32.mrb[10].mxu0  ;;  %v2988_v39 = vpop.f32.mrb[8].mxu1 }
 0x1a9   : > { %2327 = vrcp.f32 %v1101_v13  ;;  %v1957_v19 = vmul.f32 -1.442695, %v2966_v17  ;;  %v2971_v20 = vpop.f32.mrb[11].mxu0  ;;  %v2994_v44 = vpop.f32.mrb[9].mxu1 }
 0x1aa   : > { %2329 = vpow2.f32 %v1955_v14  ;;  %v1958_v22 = vmul.f32 -1.442695, %v2971_v20  ;;  %v2998_v48 = vpop.f32.mrb[10].mxu1 }
 0x1ab   : > { %v2314_v24 = vpop.eup %2313  ;;  %2331 = vpow2.f32 %v1956_v16  ;;  %v3002_v54 = vpop.f32.mrb[11].mxu1 }
 0x1ac   : > { %v2316_v26 = vpop.eup %2315  ;;  %v1102_v27 = vadd.f32 1.0, %v2314_v24  ;;  %2333 = vpow2.f32 %v1957_v19 }
 0x1ad   : > { %v2318_v28 = vpop.eup %2317  ;;  %v1103_v29 = vadd.f32 1.0, %v2316_v26  ;;  %2335 = vpow2.f32 %v1958_v22 }
 0x1ae   : > { %v2320_v30 = vpop.eup %2319  ;;  %2337 = vrcp.f32 %v1102_v27  ;;  %v1104_v31 = vadd.f32 1.0, %v2318_v28  ;;  %v2980_v32 = vpop.f32.mrb[12].mxu0 }
 0x1af   : > { %2339 = vrcp.f32 %v1103_v29  ;;  %v1105_v33 = vadd.f32 1.0, %v2320_v30  ;;  %v1959_v34 = vmul.f32 -1.442695, %v2980_v32  ;;  %v2983_v35 = vpop.f32.mrb[13].mxu0 }
 0x1b0   : > { %v2322_v36 = vpop.eup %2321  ;;  %2341 = vrcp.f32 %v1104_v31  ;;  %v1960_v37 = vmul.f32 -1.442695, %v2983_v35  ;;  %v2986_v38 = vpop.f32.mrb[14].mxu0 }
 0x1b1   : > { %v2324_v40 = vpop.eup %2323  ;;  %v1194_v41 = vmul.f32 %v2322_v36, %v2928_v49  ;;  %2343 = vrcp.f32 %v1105_v33  ;;  %v1961_v42 = vmul.f32 -1.442695, %v2986_v38  ;;  %v2992_v43 = vpop.f32.mrb[15].mxu0 }
 0x1b2   : > { %v2326_v45 = vpop.eup %2325  ;;  %v1195_v46 = vmul.f32 %v2324_v40, %v2931_v51  ;;  %2345 = vpow2.f32 %v1959_v34  ;;  %v1962_v47 = vmul.f32 -1.442695, %v2992_v43  ;;  %v3016_v16 = vpop.f32.mrb[12].mxu1 }
 0x1b3   : > { %v2328_v50 = vpop.eup %2327  ;;  %v1196_v52 = vmul.f32 %v2326_v45, %v2934_v53  ;;  %2347 = vpow2.f32 %v1960_v37  ;;  %v1226_v49 = vmul.f32 %v1194_v41, %v2948_v62  ;;  %v3022_v26 = vpop.f32.mrb[13].mxu1 }
 0x1b4   : > { %v2330_v56 = vpop.eup %2329  ;;  %v1197_v58 = vmul.f32 %v2328_v50, %v2937_v55  ;;  %2349 = vpow2.f32 %v1961_v42  ;;  %v1227_v60 = vmul.f32 %v1195_v46, %v2953_v1  ;;  %v3026_v30 = vpop.f32.mrb[14].mxu1 }
 0x1b5   : > { %v2332_v51 = vpop.eup %2331  ;;  %v1106_v63 = vadd.f32 1.0, %v2330_v56  ;;  %2351 = vpow2.f32 %v1962_v47  ;;  %v1228_v2 = vmul.f32 %v1196_v52, %v2956_v3  ;;  %v3030_v34 = vpop.f32.mrb[15].mxu1 }
 0x1b6   : > { %v2334_v4 = vpop.eup %2333  ;;  %v1107_v6 = vadd.f32 1.0, %v2332_v51  ;;  %v1229_v53 = vmul.f32 %v1197_v58, %v2958_v5  ;;  %v3008_v7 = vpop.f32.mrb[16].mxu0 }
 0x1b7   : > { %v2336_v62 = vpop.eup %2335  ;;  %2353 = vrcp.f32 %v1106_v63  ;;  %v1108_v8 = vadd.f32 1.0, %v2334_v4  ;;  %v1290_v9 = vpack.c.bf16 %v1228_v2, %v1226_v49  ;;  %v1963_v55 = vmul.f32 -1.442695, %v3008_v7  ;;  %v3011_v10 = vpop.f32.mrb[17].mxu0 }
 0x1b8   : > { %v2338_v1 = vpop.eup %2337  ;;  %2355 = vrcp.f32 %v1107_v6  ;;  %v1109_v11 = vadd.f32 1.0, %v2336_v62  ;;  %v1291_v13 = vpack.c.bf16 %v1229_v53, %v1227_v60  ;;  %v1964_v3 = vmul.f32 -1.442695, %v3011_v10  ;;  %v3014_v14 = vpop.f32.mrb[18].mxu0 }
 0x1b9   : > { %v2340_v5 = vpop.eup %2339  ;;  %v1198_v19 = vmul.f32 %v2338_v1, %v2940_v57  ;;  %2357 = vrcp.f32 %v1108_v8  ;;  %v1965_v22 = vmul.f32 -1.442695, %v3014_v14  ;;  %v3020_v24 = vpop.f32.mrb[19].mxu0 }
 0x1ba   : > { %v2342_v27 = vpop.eup %2341  ;;  %v1199_v28 = vmul.f32 %v2340_v5, %v2943_v59  ;;  %2359 = vrcp.f32 %v1109_v11  ;;  %v1966_v29 = vmul.f32 -1.442695, %v3020_v24  ;;  %1530 = vmatprep.mubr.bf16.mxu0 %v1291_v13  ;;  %v3044_v60 = vpop.f32.mrb[16].mxu1 }
 0x1bb   : > { %v2344_v31 = vpop.eup %2343  ;;  %v1200_v33 = vmul.f32 %v2342_v27, %v2946_v61  ;;  %2361 = vpow2.f32 %v1963_v55  ;;  %v1230_v57 = vmul.f32 %v1198_v19, %v2968_v18  ;;  %1531 = vmatmul.mubr.bf16.vlgmr.msra.gmra.mrb[32].mxu0 %v1290_v9  ;;  %v3049_v2 = vpop.f32.mrb[17].mxu1 }
 0x1bc   : > { %v2346_v36 = vpop.eup %2345  ;;  %v1201_v37 = vmul.f32 %v2344_v31, %v2951_v0  ;;  %2363 = vpow2.f32 %v1964_v3  ;;  %v1231_v59 = vmul.f32 %v1199_v28, %v2973_v21  ;;  %v3053_v62 = vpop.f32.mrb[18].mxu1 }
 0x1bd   : > { %v2348_v40 = vpop.eup %2347  ;;  %v1110_v41 = vadd.f32 1.0, %v2346_v36  ;;  %2365 = vpow2.f32 %v1965_v22  ;;  %v1232_v42 = vmul.f32 %v1200_v33, %v2976_v23  ;;  %v3056_v55 = vpop.f32.mrb[19].mxu1 }
 0x1be   : > { %v2350_v45 = vpop.eup %2349  ;;  %v1111_v46 = vadd.f32 1.0, %v2348_v40  ;;  %2367 = vpow2.f32 %v1966_v29  ;;  %v1233_v61 = vmul.f32 %v1201_v37, %v2978_v25  ;;  %v3036_v18 = vpop.f32.mrb[20].mxu0 }
 0x1bf   : > { %v2352_v47 = vpop.eup %2351  ;;  %2369 = vrcp.f32 %v1110_v41  ;;  %v1112_v50 = vadd.f32 1.0, %v2350_v45  ;;  %v1292_v52 = vpack.c.bf16 %v1232_v42, %v1230_v57  ;;  %v1967_v0 = vmul.f32 -1.442695, %v3036_v18  ;;  %v3039_v49 = vpop.f32.mrb[21].mxu0 }
 0x1c0   : > { %2371 = vrcp.f32 %v1111_v46  ;;  %v1113_v21 = vadd.f32 1.0, %v2352_v47  ;;  %v1293_v56 = vpack.c.bf16 %v1233_v61, %v1231_v59  ;;  %v1968_v23 = vmul.f32 -1.442695, %v3039_v49  ;;  %v3042_v58 = vpop.f32.mrb[22].mxu0  ;;  %v3071_v36 = vpop.f32.mrb[20].mxu1 }
 0x1c1   : > { %v2354_v25 = vpop.eup %2353  ;;  %2373 = vrcp.f32 %v1112_v50  ;;  %v1969_v51 = vmul.f32 -1.442695, %v3042_v58  ;;  %v3047_v63 = vpop.f32.mrb[23].mxu0 }
 0x1c2   : > { %v2356_v4 = vpop.eup %2355  ;;  %v1202_v6 = vmul.f32 %v2354_v25, %v2960_v12  ;;  %2375 = vrcp.f32 %v1113_v21  ;;  %v1970_v53 = vmul.f32 -1.442695, %v3047_v63  ;;  %1540 = vmatprep.mubr.bf16.mxu0 %v1293_v56 }
 0x1c3   : > { %v2358_v8 = vpop.eup %2357  ;;  %v1203_v9 = vmul.f32 %v2356_v4, %v2963_v15  ;;  %2377 = vpow2.f32 %v1967_v0  ;;  %1541 = vmatmul.mubr.bf16.gmra.mrb[36].mxu0 %v1292_v52 }
 0x1c4   : > { %v2360_v1 = vpop.eup %2359  ;;  %v1204_v11 = vmul.f32 %v2358_v8, %v2966_v17  ;;  %2379 = vpow2.f32 %v1968_v23  ;;  %v1234_v13 = vmul.f32 %v1202_v6, %v2988_v39 }
 0x1c5   : > { %v2362_v12 = vpop.eup %2361  ;;  %v1205_v3 = vmul.f32 %v2360_v1, %v2971_v20  ;;  %2381 = vpow2.f32 %v1969_v51  ;;  %v1235_v5 = vmul.f32 %v1203_v9, %v2994_v44 }
 0x1c6   : > { %v2364_v19 = vpop.eup %2363  ;;  %v1114_v22 = vadd.f32 1.0, %v2362_v12  ;;  %2383 = vpow2.f32 %v1970_v53  ;;  %v1236_v15 = vmul.f32 %v1204_v11, %v2998_v48  ;;  %v3063_v27 = vpop.f32.mrb[24].mxu0 }
 0x1c7   : > { %v2366_v28 = vpop.eup %2365  ;;  %v1115_v29 = vadd.f32 1.0, %v2364_v19  ;;  %v1237_v17 = vmul.f32 %v1205_v3, %v3002_v54  ;;  %v3066_v31 = vpop.f32.mrb[25].mxu0  ;;  %v1971_v57 = vmul.f32 -1.442695, %v3063_v27 }
 0x1c8   : > { %v2368_v39 = vpop.eup %2367  ;;  %2385 = vrcp.f32 %v1114_v22  ;;  %v1116_v33 = vadd.f32 1.0, %v2366_v28  ;;  %v1294_v20 = vpack.c.bf16 %v1236_v15, %v1234_v13  ;;  %v3069_v44 = vpop.f32.mrb[26].mxu0  ;;  %v1972_v40 = vmul.f32 -1.442695, %v3066_v31 }
 0x1c9   : > { %v2370_v37 = vpop.eup %2369  ;;  %2387 = vrcp.f32 %v1115_v29  ;;  %v1117_v48 = vadd.f32 1.0, %v2368_v39  ;;  %v1295_v59 = vpack.c.bf16 %v1237_v17, %v1235_v5  ;;  %v3074_v41 = vpop.f32.mrb[27].mxu0  ;;  %v1973_v46 = vmul.f32 -1.442695, %v3069_v44 }
 0x1ca   : > { %v3076_v54 = vpop.f32.mrb[21].mxu1  ;;  %v2372_v42 = vpop.eup %2371  ;;  %v1206_v45 = vmul.f32 %v2370_v37, %v2980_v32  ;;  %2389 = vrcp.f32 %v1116_v33  ;;  %v1974_v52 = vmul.f32 -1.442695, %v3074_v41 }
 0x1cb   : > { %v3080_v61 = vpop.f32.mrb[22].mxu1  ;;  %v2374_v47 = vpop.eup %2373  ;;  %v1207_v50 = vmul.f32 %v2372_v42, %v2983_v35  ;;  %2391 = vrcp.f32 %v1117_v48  ;;  %1550 = vmatprep.mubr.bf16.mxu0 %v1295_v59 }
 0x1cc   : > { %v3084_v0 = vpop.f32.mrb[23].mxu1  ;;  %v2376_v21 = vpop.eup %2375  ;;  %v1208_v56 = vmul.f32 %v2374_v47, %v2986_v38  ;;  %2393 = vpow2.f32 %v1971_v57  ;;  %v1238_v32 = vmul.f32 %v1206_v45, %v3016_v16  ;;  %1551 = vmatmul.mubr.bf16.gmra.mrb[40].mxu0 %v1294_v20 }
 0x1cd   : > { %v2378_v23 = vpop.eup %2377  ;;  %v1209_v25 = vmul.f32 %v2376_v21, %v2992_v43  ;;  %2395 = vpow2.f32 %v1972_v40  ;;  %v1239_v51 = vmul.f32 %v1207_v50, %v3022_v26  ;;  %v3099_v12 = vpop.f32.mrb[24].mxu1 }
 0x1ce   : > { %v2380_v35 = vpop.eup %2379  ;;  %v1118_v4 = vadd.f32 1.0, %v2378_v23  ;;  %2397 = vpow2.f32 %v1973_v46  ;;  %v1240_v6 = vmul.f32 %v1208_v56, %v3026_v30  ;;  %v3091_v53 = vpop.f32.mrb[28].mxu0 }
 0x1cf   : > { %v2382_v8 = vpop.eup %2381  ;;  %v1119_v9 = vadd.f32 1.0, %v2380_v35  ;;  %2399 = vpow2.f32 %v1974_v52  ;;  %v1241_v38 = vmul.f32 %v1209_v25, %v3030_v34  ;;  %v3094_v16 = vpop.f32.mrb[29].mxu0  ;;  %v1975_v26 = vmul.f32 -1.442695, %v3091_v53 }
 0x1d0   : > { %v2384_v1 = vpop.eup %2383  ;;  %2401 = vrcp.f32 %v1118_v4  ;;  %v1120_v43 = vadd.f32 1.0, %v2382_v8  ;;  %v1296_v11 = vpack.c.bf16 %v1240_v6, %v1238_v32  ;;  %v3097_v13 = vpop.f32.mrb[30].mxu0  ;;  %v1976_v5 = vmul.f32 -1.442695, %v3094_v16 }
 0x1d1   : > { %2403 = vrcp.f32 %v1119_v9  ;;  %v1121_v30 = vadd.f32 1.0, %v2384_v1  ;;  %v1297_v3 = vpack.c.bf16 %v1241_v38, %v1239_v51  ;;  %v3102_v19 = vpop.f32.mrb[31].mxu0  ;;  %v3104_v34 = vpop.f32.mrb[25].mxu1  ;;  %v1977_v15 = vmul.f32 -1.442695, %v3097_v13 }
 0x1d2   : > { %v2386_v22 = vpop.eup %2385  ;;  %2405 = vrcp.f32 %v1120_v43  ;;  %v3107_v28 = vpop.f32.mrb[26].mxu1  ;;  %v1978_v39 = vmul.f32 -1.442695, %v3102_v19 }
 0x1d3   : > { %v2388_v29 = vpop.eup %2387  ;;  %v1210_v17 = vmul.f32 %v2386_v22, %v3008_v7  ;;  %2407 = vrcp.f32 %v1121_v30  ;;  %1560 = vmatprep.mubr.bf16.mxu0 %v1297_v3  ;;  %v3111_v33 = vpop.f32.mrb[27].mxu1 }
 0x1d4   : > { %v2390_v20 = vpop.eup %2389  ;;  %v1211_v57 = vmul.f32 %v2388_v29, %v3011_v10  ;;  %2409 = vpow2.f32 %v1975_v26  ;;  %1561 = vmatmul.mubr.bf16.gmra.mrb[44].mxu0 %v1296_v11  ;;  %v3120_v21 = vpop.f32.mrb[28].mxu1 }
 0x1d5   : > { %v2392_v37 = vpop.eup %2391  ;;  %v1212_v48 = vmul.f32 %v2390_v20, %v3014_v14  ;;  %2411 = vpow2.f32 %v1976_v5  ;;  %v1242_v59 = vmul.f32 %v1210_v17, %v3044_v60  ;;  %v3122_v32 = vpop.f32.mrb[29].mxu1 }
 0x1d6   : > { %v2394_v40 = vpop.eup %2393  ;;  %v1213_v7 = vmul.f32 %v2392_v37, %v3020_v24  ;;  %2413 = vpow2.f32 %v1977_v15  ;;  %v1243_v42 = vmul.f32 %v1211_v57, %v3049_v2  ;;  %v997_v25 = vpop.f32.mrb[30].mxu1 }
 0x1d7   : > { %v2396_v45 = vpop.eup %2395  ;;  %v1122_v46 = vadd.f32 1.0, %v2394_v40  ;;  %2415 = vpow2.f32 %v1978_v39  ;;  %v1244_v47 = vmul.f32 %v1212_v48, %v3053_v62  ;;  %v999_v35 = vpop.f32.mrb[31].mxu1 }
 0x1d8   : > { %v2398_v10 = vpop.eup %2397  ;;  %v1123_v50 = vadd.f32 1.0, %v2396_v45  ;;  %v1245_v52 = vmul.f32 %v1213_v7, %v3056_v55 }
 0x1d9   : > { %v2400_v14 = vpop.eup %2399  ;;  %2417 = vrcp.f32 %v1122_v46  ;;  %v1124_v60 = vadd.f32 1.0, %v2398_v10  ;;  %v1298_v56 = vpack.c.bf16 %v1244_v47, %v1242_v59 }
 0x1da   : > { %v2402_v24 = vpop.eup %2401  ;;  %2419 = vrcp.f32 %v1123_v50  ;;  %v1125_v2 = vadd.f32 1.0, %v2400_v14  ;;  %v1299_v23 = vpack.c.bf16 %v1245_v52, %v1243_v42  ;;  %v1259_v52 = vld [vmem:[#allocation2 + $0x8] sm:$0xff]  ;;  %v1260_v14 = vld [vmem:[#allocation2 + $0x10] sm:$0xff] }
 0x1db   : > { %v2404_v51 = vpop.eup %2403  ;;  %v1214_v62 = vmul.f32 %v2402_v24, %v3036_v18  ;;  %2421 = vrcp.f32 %v1124_v60 }
 0x1dc   : > { %v2406_v4 = vpop.eup %2405  ;;  %v1215_v55 = vmul.f32 %v2404_v51, %v3039_v49  ;;  %2423 = vrcp.f32 %v1125_v2  ;;  %1570 = vmatprep.mubr.bf16.mxu1 %v1299_v23  ;;  %v1262_v23 = vld [vmem:[#allocation2 + $0x20] sm:$0xff] }
 0x1dd   : > { %v2408_v6 = vpop.eup %2407  ;;  %v1216_v8 = vmul.f32 %v2406_v4, %v3042_v58  ;;  %v1246_v9 = vmul.f32 %v1214_v62, %v3071_v36  ;;  %1571 = vmatmul.mubr.bf16.vlgmr.msra.gmra.mrb[32].mxu1 %v1298_v56  ;;  %v1264_v62 = vld [vmem:[#allocation2 + $0x30] sm:$0xff] }
 0x1de   : > { %v2410_v38 = vpop.eup %2409  ;;  %v1217_v1 = vmul.f32 %v2408_v6, %v3047_v63  ;;  %v1247_v43 = vmul.f32 %v1215_v55, %v3076_v54  ;;  %v1265_v55 = vld [vmem:[#allocation2 + $0x38] sm:$0xff] }
 0x1df   : > { %v2412_v11 = vpop.eup %2411  ;;  %v1126_v18 = vadd.f32 1.0, %v2410_v38  ;;  %v1248_v26 = vmul.f32 %v1216_v8, %v3080_v61 }
 0x1e0   : > { %v2414_v30 = vpop.eup %2413  ;;  %v1127_v3 = vadd.f32 1.0, %v2412_v11  ;;  %v1249_v49 = vmul.f32 %v1217_v1, %v3084_v0  ;;  %v1267_v11 = vld [vmem:[#allocation2 + $0x48] sm:$0xff] }
 0x1e1   : > { %v2416_v5 = vpop.eup %2415  ;;  %2425 = vrcp.f32 %v1126_v18  ;;  %v1128_v22 = vadd.f32 1.0, %v2414_v30  ;;  %v1300_v58 = vpack.c.bf16 %v1248_v26, %v1246_v9  ;;  %v1268_v26 = vld [vmem:[#allocation2 + $0x50] sm:$0xff] }
 0x1e2   : > { %2427 = vrcp.f32 %v1127_v3  ;;  %v1129_v36 = vadd.f32 1.0, %v2416_v5  ;;  %v1301_v15 = vpack.c.bf16 %v1249_v49, %v1247_v43  ;;  %v1266_v43 = vld [vmem:[#allocation2 + $0x40] sm:$0xff]  ;;  %v1269_v49 = vld [vmem:[#allocation2 + $0x58] sm:$0xff] }
 0x1e3   : > { %v2418_v29 = vpop.eup %2417  ;;  %2429 = vrcp.f32 %v1128_v22 }
 0x1e4   : > { %v2420_v63 = vpop.eup %2419  ;;  %v1218_v54 = vmul.f32 %v2418_v29, %v3063_v27  ;;  %2431 = vrcp.f32 %v1129_v36  ;;  %1580 = vmatprep.mubr.bf16.mxu1 %v1301_v15  ;;  %v1270_v29 = vld [vmem:[#allocation2 + $0x60] sm:$0xff] }
 0x1e5   : > { %v2422_v17 = vpop.eup %2421  ;;  %v1219_v61 = vmul.f32 %v2420_v63, %v3066_v31  ;;  %1581 = vmatmul.mubr.bf16.gmra.mrb[36].mxu1 %v1300_v58  ;;  %v1271_v63 = vld [vmem:[#allocation2 + $0x68] sm:$0xff] }
 0x1e6   : > { %v2424_v39 = vpop.eup %2423  ;;  %v1220_v0 = vmul.f32 %v2422_v17, %v3069_v44  ;;  %v1250_v20 = vmul.f32 %v1218_v54, %v3099_v12  ;;  %v1272_v17 = vld [vmem:[#allocation2 + $0x70] sm:$0xff] }
 0x1e7   : > { %v1221_v57 = vmul.f32 %v2424_v39, %v3074_v41  ;;  %v1251_v37 = vmul.f32 %v1219_v61, %v3104_v34 }
 0x1e8   : > { %v1252_v48 = vmul.f32 %v1220_v0, %v3107_v28  ;;  %v1273_v0 = vld [vmem:[#allocation2 + $0x78] sm:$0xff] }
 0x1e9   : > { %v1253_v59 = vmul.f32 %v1221_v57, %v3111_v33 }
 0x1ea   : > { %v1302_v27 = vpack.c.bf16 %v1252_v48, %v1250_v20 }
 0x1eb   : > { %v2426_v40 = vpop.eup %2425  ;;  %v1303_v7 = vpack.c.bf16 %v1253_v59, %v1251_v37 }
 0x1ec   : > { %v2428_v42 = vpop.eup %2427  ;;  %v1222_v31 = vmul.f32 %v2426_v40, %v3091_v53  ;;  %v1258_v53 = vld [vmem:[#allocation2] sm:$0xff]  ;;  %v1275_v40 = vld [vmem:[#allocation2 + $0x88] sm:$0xff] }
 0x1ed   : > { %v2430_v45 = vpop.eup %2429  ;;  %v1223_v46 = vmul.f32 %v2428_v42, %v3094_v16  ;;  %1590 = vmatprep.mubr.bf16.mxu1 %v1303_v7  ;;  %v1276_v42 = vld [vmem:[#allocation2 + $0x90] sm:$0xff] }
 0x1ee   : > { %v2432_v44 = vpop.eup %2431  ;;  %v1224_v12 = vmul.f32 %v2430_v45, %v3097_v13  ;;  %v1254_v41 = vmul.f32 %v1222_v31, %v3120_v21  ;;  %1591 = vmatmul.mubr.bf16.gmra.mrb[40].mxu1 %v1302_v27  ;;  %v1261_v13 = vld [vmem:[#allocation2 + $0x18] sm:$0xff]  ;;  %v1274_v27 = vld [vmem:[#allocation2 + $0x80] sm:$0xff] }
 0x1ef   : > { %v1225_v34 = vmul.f32 %v2432_v44, %v3102_v19  ;;  %v1255_v28 = vmul.f32 %v1223_v46, %v3122_v32  ;;  %v1277_v46 = vld [vmem:[#allocation2 + $0x98] sm:$0xff] }
 0x1f0   : > { %v1256_v33 = vmul.f32 %v1224_v12, %v997_v25  ;;  %v1263_v25 = vld [vmem:[#allocation2 + $0x28] sm:$0xff] }
 0x1f1   : > { %v1257_v47 = vmul.f32 %v1225_v34, %v999_v35 }
 0x1f2   : > { %v1304_v10 = vpack.c.bf16 %v1256_v33, %v1254_v41  ;;  %v1278_v33 = vld [vmem:[#allocation2 + $0xa0] sm:$0xff] }
 0x1f3   : > { %v1305_v50 = vpack.c.bf16 %v1257_v47, %v1255_v28  ;;  %v1279_v47 = vld [vmem:[#allocation2 + $0xa8] sm:$0xff] }
 0x1f5   : > { %1600 = vmatprep.mubr.bf16.mxu1 %v1305_v50  ;;  %v1280_v50 = vld [vmem:[#allocation2 + $0xb0] sm:$0xff] }
 0x1f6   : > { %1601 = vmatmul.mubr.bf16.gmra.mrb[44].mxu1 %v1304_v10 }
 0x28e   : > { %v1532_v16 = vpop.f32.mrb[32].mxu0 }
 0x28f   : > { %v1611_v60 = vadd.f32 %v1532_v16, %v1258_v53  ;;  %v1534_v56 = vpop.f32.mrb[33].mxu0  ;;  %v1281_v16 = vld [vmem:[#allocation2 + $0xb8] sm:$0xff] }
 0x290   : > { %v1612_v24 = vadd.f32 %v1534_v56, %v1259_v52  ;;  %v1536_v21 = vpop.f32.mrb[34].mxu0 }
 0x291   : > { %1643 = vst [vmem:[#allocation2] sm:$0xff] %v1611_v60  ;;  %v1613_v2 = vadd.f32 %v1536_v21, %v1260_v14  ;;  %v1538_v19 = vpop.f32.mrb[35].mxu0  ;;  %v1282_v21 = vld [vmem:[#allocation2 + $0xc0] sm:$0xff] }
 0x292   : > { %1644 = vst [vmem:[#allocation2 + $0x8] sm:$0xff] %v1612_v24  ;;  %v1614_v32 = vadd.f32 %v1538_v19, %v1261_v13 }
 0x293   : > { %1645 = vst [vmem:[#allocation2 + $0x10] sm:$0xff] %v1613_v2  ;;  %v1283_v2 = vld [vmem:[#allocation2 + $0xc8] sm:$0xff] }
 0x294   : > { %1646 = vst [vmem:[#allocation2 + $0x18] sm:$0xff] %v1614_v32  ;;  %v1284_v32 = vld [vmem:[#allocation2 + $0xd0] sm:$0xff] }
 0x296   : > { %v1542_v51 = vpop.f32.mrb[36].mxu0 }
 0x297   : > { %v1615_v35 = vadd.f32 %v1542_v51, %v1262_v23  ;;  %v1544_v4 = vpop.f32.mrb[37].mxu0  ;;  %v1285_v51 = vld [vmem:[#allocation2 + $0xd8] sm:$0xff] }
 0x298   : > { %v1616_v6 = vadd.f32 %v1544_v4, %v1263_v25  ;;  %v1546_v8 = vpop.f32.mrb[38].mxu0 }
 0x299   : > { %1647 = vst [vmem:[#allocation2 + $0x20] sm:$0xff] %v1615_v35  ;;  %v1617_v9 = vadd.f32 %v1546_v8, %v1264_v62  ;;  %v1548_v38 = vpop.f32.mrb[39].mxu0  ;;  %v1286_v8 = vld [vmem:[#allocation2 + $0xe0] sm:$0xff] }
 0x29a   : > { %1648 = vst [vmem:[#allocation2 + $0x28] sm:$0xff] %v1616_v6  ;;  %v1618_v1 = vadd.f32 %v1548_v38, %v1265_v55 }
 0x29b   : > { %1649 = vst [vmem:[#allocation2 + $0x30] sm:$0xff] %v1617_v9  ;;  %v1287_v9 = vld [vmem:[#allocation2 + $0xe8] sm:$0xff] }
 0x29c   : > { %1650 = vst [vmem:[#allocation2 + $0x38] sm:$0xff] %v1618_v1  ;;  %v1288_v1 = vld [vmem:[#allocation2 + $0xf0] sm:$0xff] }
 0x29f   : > { %v1552_v18 = vpop.f32.mrb[40].mxu0 }
 0x2a0   : > { %v1619_v30 = vadd.f32 %v1552_v18, %v1266_v43  ;;  %v1554_v3 = vpop.f32.mrb[41].mxu0  ;;  %v1289_v18 = vld [vmem:[#allocation2 + $0xf8] sm:$0xff] }
 0x2a1   : > { %v1620_v5 = vadd.f32 %v1554_v3, %v1267_v11  ;;  %v1556_v22 = vpop.f32.mrb[42].mxu0 }
 0x2a2   : > { %1651 = vst [vmem:[#allocation2 + $0x40] sm:$0xff] %v1619_v30  ;;  %v1621_v58 = vadd.f32 %v1556_v22, %v1268_v26  ;;  %v1558_v36 = vpop.f32.mrb[43].mxu0  ;;  %v1679_v22 = vld [vmem:[#allocation2] sm:$0xff] (!%p2011_p0) }
 0x2a3   : > { %1652 = vst [vmem:[#allocation2 + $0x48] sm:$0xff] %v1620_v5  ;;  %v1622_v15 = vadd.f32 %v1558_v36, %v1269_v49  ;;  %v1681_v36 = vld [vmem:[#allocation2 + $0x10] sm:$0xff] (!%p2011_p0)  ;;  %1711 = vst [vmem:[#allocation9] sm:$0xff] (!%p2011_p0), %v1679_v22 }
 0x2a4   : > { %1653 = vst [vmem:[#allocation2 + $0x50] sm:$0xff] %v1621_v58  ;;  %v1680_v58 = vld [vmem:[#allocation2 + $0x8] sm:$0xff] (!%p2011_p0)  ;;  %1713 = vst [vmem:[#allocation9 + $0x10] sm:$0xff] (!%p2011_p0), %v1681_v36 }
 0x2a5   : > { %1654 = vst [vmem:[#allocation2 + $0x58] sm:$0xff] %v1622_v15  ;;  %1712 = vst [vmem:[#allocation9 + $0x8] sm:$0xff] (!%p2011_p0), %v1680_v58  ;;  %v1682_v15 = vld [vmem:[#allocation2 + $0x18] sm:$0xff] (!%p2011_p0) }
 0x2a6   : > { %1714 = vst [vmem:[#allocation9 + $0x18] sm:$0xff] (!%p2011_p0), %v1682_v15 }
 0x2a7   : > { %v1562_v54 = vpop.f32.mrb[44].mxu0 }
 0x2a8   : > { %v1623_v61 = vadd.f32 %v1562_v54, %v1270_v29  ;;  %v1564_v39 = vpop.f32.mrb[45].mxu0  ;;  %v1683_v29 = vld [vmem:[#allocation2 + $0x20] sm:$0xff] (!%p2011_p0)  ;;  %v1685_v54 = vld [vmem:[#allocation2 + $0x30] sm:$0xff] (!%p2011_p0) }
 0x2a9   : > { %v1624_v20 = vadd.f32 %v1564_v39, %v1271_v63  ;;  %v1566_v57 = vpop.f32.mrb[46].mxu0  ;;  %v1684_v63 = vld [vmem:[#allocation2 + $0x28] sm:$0xff] (!%p2011_p0)  ;;  %1715 = vst [vmem:[#allocation9 + $0x20] sm:$0xff] (!%p2011_p0), %v1683_v29  ;;  %1717 = vst [vmem:[#allocation9 + $0x30] sm:$0xff] (!%p2011_p0), %v1685_v54 }
 0x2aa   : > { %1655 = vst [vmem:[#allocation2 + $0x60] sm:$0xff] %v1623_v61  ;;  %v1625_v37 = vadd.f32 %v1566_v57, %v1272_v17  ;;  %v1568_v48 = vpop.f32.mrb[47].mxu0  ;;  %1716 = vst [vmem:[#allocation9 + $0x28] sm:$0xff] (!%p2011_p0), %v1684_v63  ;;  %v1686_v17 = vld [vmem:[#allocation2 + $0x38] sm:$0xff] (!%p2011_p0)  ;;  %v1687_v61 = vld [vmem:[#allocation2 + $0x40] sm:$0xff] (!%p2011_p0) }
 0x2ab   : > { %1656 = vst [vmem:[#allocation2 + $0x68] sm:$0xff] %v1624_v20  ;;  %v1626_v59 = vadd.f32 %v1568_v48, %v1273_v0  ;;  %1718 = vst [vmem:[#allocation9 + $0x38] sm:$0xff] (!%p2011_p0), %v1686_v17  ;;  %v1688_v39 = vld [vmem:[#allocation2 + $0x48] sm:$0xff] (!%p2011_p0)  ;;  %v1689_v0 = vld [vmem:[#allocation2 + $0x50] sm:$0xff] (!%p2011_p0) }
 0x2ac   : > { %1657 = vst [vmem:[#allocation2 + $0x70] sm:$0xff] %v1625_v37  ;;  %1719 = vst [vmem:[#allocation9 + $0x40] sm:$0xff] (!%p2011_p0), %v1687_v61  ;;  %v1690_v20 = vld [vmem:[#allocation2 + $0x58] sm:$0xff] (!%p2011_p0) }
 0x2ad   : > { %1658 = vst [vmem:[#allocation2 + $0x78] sm:$0xff] %v1626_v59  ;;  %1720 = vst [vmem:[#allocation9 + $0x48] sm:$0xff] (!%p2011_p0), %v1688_v39 }
 0x2ae   : > { %1721 = vst [vmem:[#allocation9 + $0x50] sm:$0xff] (!%p2011_p0), %v1689_v0  ;;  %1722 = vst [vmem:[#allocation9 + $0x58] sm:$0xff] (!%p2011_p0), %v1690_v20 }
 0x2b0   : > { %v1572_v7 = vpop.f32.mrb[32].mxu1 }
 0x2b1   : > { %v1627_v31 = vadd.f32 %v1572_v7, %v1274_v27  ;;  %v1574_v45 = vpop.f32.mrb[33].mxu1  ;;  %v1691_v57 = vld [vmem:[#allocation2 + $0x60] sm:$0xff] (!%p2011_p0) }
 0x2b2   : > { %v1628_v44 = vadd.f32 %v1574_v45, %v1275_v40  ;;  %v1576_v12 = vpop.f32.mrb[34].mxu1  ;;  %v1692_v37 = vld [vmem:[#allocation2 + $0x68] sm:$0xff] (!%p2011_p0)  ;;  %1723 = vst [vmem:[#allocation9 + $0x60] sm:$0xff] (!%p2011_p0), %v1691_v57 }
 0x2b3   : > { %1659 = vst [vmem:[#allocation2 + $0x80] sm:$0xff] %v1627_v31  ;;  %v1629_v41 = vadd.f32 %v1576_v12, %v1276_v42  ;;  %v1578_v34 = vpop.f32.mrb[35].mxu1  ;;  %v1693_v48 = vld [vmem:[#allocation2 + $0x70] sm:$0xff] (!%p2011_p0)  ;;  %1724 = vst [vmem:[#allocation9 + $0x68] sm:$0xff] (!%p2011_p0), %v1692_v37 }
 0x2b4   : > { %1660 = vst [vmem:[#allocation2 + $0x88] sm:$0xff] %v1628_v44  ;;  %v1630_v28 = vadd.f32 %v1578_v34, %v1277_v46  ;;  %1725 = vst [vmem:[#allocation9 + $0x70] sm:$0xff] (!%p2011_p0), %v1693_v48  ;;  %v1694_v59 = vld [vmem:[#allocation2 + $0x78] sm:$0xff] (!%p2011_p0) }
 0x2b5   : > { %1661 = vst [vmem:[#allocation2 + $0x90] sm:$0xff] %v1629_v41  ;;  %1726 = vst [vmem:[#allocation9 + $0x78] sm:$0xff] (!%p2011_p0), %v1694_v59 }
 0x2b6   : > { %1662 = vst [vmem:[#allocation2 + $0x98] sm:$0xff] %v1630_v28 }
 0x2b8   : > { %v1582_v10 = vpop.f32.mrb[36].mxu1 }
 0x2b9   : > { %v1631_v53 = vadd.f32 %v1582_v10, %v1278_v33  ;;  %v1584_v52 = vpop.f32.mrb[37].mxu1 }
 0x2ba   : > { %v1632_v14 = vadd.f32 %v1584_v52, %v1279_v47  ;;  %v1586_v60 = vpop.f32.mrb[38].mxu1  ;;  %v1695_v27 = vld [vmem:[#allocation2 + $0x80] sm:$0xff] (!%p2011_p0) }
 0x2bb   : > { %1663 = vst [vmem:[#allocation2 + $0xa0] sm:$0xff] %v1631_v53  ;;  %v1633_v56 = vadd.f32 %v1586_v60, %v1280_v50  ;;  %v1588_v13 = vpop.f32.mrb[39].mxu1  ;;  %v1696_v40 = vld [vmem:[#allocation2 + $0x88] sm:$0xff] (!%p2011_p0)  ;;  %1727 = vst [vmem:[#allocation9 + $0x80] sm:$0xff] (!%p2011_p0), %v1695_v27 }
 0x2bc   : > { %1664 = vst [vmem:[#allocation2 + $0xa8] sm:$0xff] %v1632_v14  ;;  %v1634_v24 = vadd.f32 %v1588_v13, %v1281_v16  ;;  %1728 = vst [vmem:[#allocation9 + $0x88] sm:$0xff] (!%p2011_p0), %v1696_v40  ;;  %v1697_v7 = vld [vmem:[#allocation2 + $0x90] sm:$0xff] (!%p2011_p0) }
 0x2bd   : > { %1665 = vst [vmem:[#allocation2 + $0xb0] sm:$0xff] %v1633_v56  ;;  %v1698_v42 = vld [vmem:[#allocation2 + $0x98] sm:$0xff] (!%p2011_p0)  ;;  %1729 = vst [vmem:[#allocation9 + $0x90] sm:$0xff] (!%p2011_p0), %v1697_v7 }
 0x2be   : > { %1666 = vst [vmem:[#allocation2 + $0xb8] sm:$0xff] %v1634_v24  ;;  %1730 = vst [vmem:[#allocation9 + $0x98] sm:$0xff] (!%p2011_p0), %v1698_v42 }
 0x2c1   : > { %v1592_v19 = vpop.f32.mrb[40].mxu1 }
 0x2c2   : > { %v1635_v23 = vadd.f32 %v1592_v19, %v1282_v21  ;;  %v1594_v25 = vpop.f32.mrb[41].mxu1  ;;  %v1699_v31 = vld [vmem:[#allocation2 + $0xa0] sm:$0xff] (!%p2011_p0) }
 0x2c3   : > { %v1636_v62 = vadd.f32 %v1594_v25, %v1283_v2  ;;  %v1596_v35 = vpop.f32.mrb[42].mxu1  ;;  %1731 = vst [vmem:[#allocation9 + $0xa0] sm:$0xff] (!%p2011_p0), %v1699_v31  ;;  %v1700_v45 = vld [vmem:[#allocation2 + $0xa8] sm:$0xff] (!%p2011_p0) }
 0x2c4   : > { %1667 = vst [vmem:[#allocation2 + $0xc0] sm:$0xff] %v1635_v23  ;;  %v1637_v4 = vadd.f32 %v1596_v35, %v1284_v32  ;;  %v1598_v55 = vpop.f32.mrb[43].mxu1  ;;  %v1701_v46 = vld [vmem:[#allocation2 + $0xb0] sm:$0xff] (!%p2011_p0)  ;;  %1732 = vst [vmem:[#allocation9 + $0xa8] sm:$0xff] (!%p2011_p0), %v1700_v45 }
 0x2c5   : > { %1668 = vst [vmem:[#allocation2 + $0xc8] sm:$0xff] %v1636_v62  ;;  %v1638_v6 = vadd.f32 %v1598_v55, %v1285_v51  ;;  %v1702_v44 = vld [vmem:[#allocation2 + $0xb8] sm:$0xff] (!%p2011_p0)  ;;  %1733 = vst [vmem:[#allocation9 + $0xb0] sm:$0xff] (!%p2011_p0), %v1701_v46 }
 0x2c6   : > { %1669 = vst [vmem:[#allocation2 + $0xd0] sm:$0xff] %v1637_v4  ;;  %1734 = vst [vmem:[#allocation9 + $0xb8] sm:$0xff] (!%p2011_p0), %v1702_v44 }
 0x2c7   : > { %1670 = vst [vmem:[#allocation2 + $0xd8] sm:$0xff] %v1638_v6 }
 0x2c9   : > { %v1602_v38 = vpop.f32.mrb[44].mxu1  ;;  %1678 = sbr.rel (%p2011_p0) target bundleno = 728 (0x2d8), region = 52 }
 0x2ca   : > { %v1639_v43 = vadd.f32 %v1602_v38, %v1286_v8  ;;  %v1604_v11 = vpop.f32.mrb[45].mxu1 }
 0x2cb   : > { %v1640_v26 = vadd.f32 %v1604_v11, %v1287_v9  ;;  %v1606_v30 = vpop.f32.mrb[46].mxu1  ;;  %v1703_v12 = vld [vmem:[#allocation2 + $0xc0] sm:$0xff] (!%p2011_p0) }
 0x2cc   : > { %1671 = vst [vmem:[#allocation2 + $0xe0] sm:$0xff] %v1639_v43  ;;  %v1641_v3 = vadd.f32 %v1606_v30, %v1288_v1  ;;  %v1608_v49 = vpop.f32.mrb[47].mxu1  ;;  %v1704_v41 = vld [vmem:[#allocation2 + $0xc8] sm:$0xff] (!%p2011_p0)  ;;  %1735 = vst [vmem:[#allocation9 + $0xc0] sm:$0xff] (!%p2011_p0), %v1703_v12 }
 0x2cd   : > { %1672 = vst [vmem:[#allocation2 + $0xe8] sm:$0xff] %v1640_v26  ;;  %v1642_v5 = vadd.f32 %v1608_v49, %v1289_v18  ;;  %v1705_v34 = vld [vmem:[#allocation2 + $0xd0] sm:$0xff] (!%p2011_p0)  ;;  %1736 = vst [vmem:[#allocation9 + $0xc8] sm:$0xff] (!%p2011_p0), %v1704_v41 }
 0x2ce   : > { %1673 = vst [vmem:[#allocation2 + $0xf0] sm:$0xff] %v1641_v3  ;;  %1737 = vst [vmem:[#allocation9 + $0xd0] sm:$0xff] (!%p2011_p0), %v1705_v34  ;;  %v1706_v28 = vld [vmem:[#allocation2 + $0xd8] sm:$0xff] (!%p2011_p0) }
 0x2cf   : > { %1674 = vst [vmem:[#allocation2 + $0xf8] sm:$0xff] %v1642_v5  ;;  %1738 = vst [vmem:[#allocation9 + $0xd8] sm:$0xff] (!%p2011_p0), %v1706_v28 }
 0x2d3   : > { %v1707_v33 = vld [vmem:[#allocation2 + $0xe0] sm:$0xff] }
 0x2d4   : > { %v1708_v47 = vld [vmem:[#allocation2 + $0xe8] sm:$0xff]  ;;  %1739 = vst [vmem:[#allocation9 + $0xe0] sm:$0xff] %v1707_v33 }
 0x2d5   : > { %1740 = vst [vmem:[#allocation9 + $0xe8] sm:$0xff] %v1708_v47  ;;  %v1709_v10 = vld [vmem:[#allocation2 + $0xf0] sm:$0xff] }
 0x2d6   : > { %v1710_v50 = vld [vmem:[#allocation2 + $0xf8] sm:$0xff]  ;;  %1741 = vst [vmem:[#allocation9 + $0xf0] sm:$0xff] %v1709_v10 }
 0x2d7   : > { %1742 = vst [vmem:[#allocation9 + $0xf8] sm:$0xff] %v1710_v50 }
 0x2d8 PF: > { %p2077_p5 = scmp.eq.s32.totalorder %s2727_s30, 1  ;;  %s2616_s15 = smov [#allocation9]  }
 0x2d9   : > { %s1753_s6 = sshll.u32 %s2616_s15, 4  ;;  %s1754_s6 = int_to_ptr.vmem [resolvable:$true] %s1753_s6 }
 0x2da   : > { %s2521_s19 = scalar_lea.vmem %s1754_s6, 4096  ;;  %p2528_p13 = scmp.lt.s32.totalorder %s1754_s6, %s1754_s6 }
 0x2db   : > { %p2522_p1 = scmp.ne.s32.totalorder %s1754_s6, %s2521_s19  ;;  %p2529_p2 = scmp.lt.s32.totalorder %s2521_s19, %s2521_s19 }
 0x2dd   : > { %p2523_p4 = pnand %p2522_p1, %p2077_p5  ;;  %p2530_p7 = por %p2529_p2, %p2528_p13 }
 0x2df   : > { %p2524_p8 = pneg %p2523_p4 }
 0x2e1   : > { %p2531_p9 = pnand %p2530_p7, %p2524_p8 }
 0x2e3   : > { %2534 = shalt.err (!%p2531_p9)
}
 0x2e4   : > { %s2535_s11 = scalar_lea.hbm %s3191_s3, 4096 }
 0x2e5   : > { %p2536_p3 = scmp.ne.s32.totalorder %s3191_s3, %s2535_s11  ;;  %p2541_p10 = scmp.lt.u32.totalorder %s2535_s11, %s3191_s3 }
 0x2e7   : > { %p2537_p11 = pnand %p2536_p3, %p2077_p5 }
 0x2e9   : > { %p2538_p12 = pneg %p2537_p11 }
 0x2eb   : > { %p2543_p6 = pnand %p2541_p10, %p2538_p12 }
 0x2ed   : > { %2546 = shalt.err (!%p2543_p6)
}
 0x2ee   : > { %s2617_s9 = smov 256   ;;  %s2618_s12 = smov 16  }
 0x2ef   : > { %2060 = dma.vmem_to_hbm [thread:$0]  (%p2077_p5), %s1754_s6, 4096, %s3191_s3, [#allocation5], %s2617_s9, %s2617_s9, %s2618_s12  }
 0x2f0   : > { %2580 = dma.done.wait (%p2077_p5), [#allocation5], 4096  }
 0x2f1   : > { %2582 = vsyncadd (%p2077_p5), [#allocation5], 4294963200 }
 0x2f2 PF: > { %s18_s17 = sadd.s32 1, %s2605_s17   ;;  %s3209_s12 = smov %s2589_s13 }
 0x2f3   : > { %p15_p0 = scmp.ge.s32.totalorder %s18_s17, 4   ;;  %s3210_s13 = smov %s2593_s14 }
 0x2f4   : > { %s3211_s14 = smov %s2683_s24  ;;  %s3212_s15 = smov %s2601_s16 }
 0x2f5   : > { %s3213_s16 = smov %s3215_s18  ;;  %17 = sbr.rel (!%p15_p0) target bundleno = 6 (0x6), region = 95 }
 0x2fc   :  { %1769 = vsyncpa [#allocation4], 1 }
 0x2fd   :  { %1771 = vsyncpa [#allocation4 + $0x1], 1 }
 0x2fe   :  { %1772 = vsyncpa [#allocation7], 1 }
 0x2ff   :  { %1774 = vsyncpa [#allocation7 + $0x1], 1 }
 0x300   :  { %1775 = vsyncpa [#allocation5], 1 }
 0x301   :  { %1777 = vsyncpa [#allocation5 + $0x1], 1 }

</bundles_post_ra>
